<compile_context>
chip_gen: v5e
topology: v5e:2x2
jax: 0.10.0
libtpu: 0.0.40
codegen_flags: <defaults>
</compile_context>

<pallas_src>
import functools

import jax
import jax.numpy as jnp
from jax.experimental import pallas as pl
from jax.experimental.pallas import tpu as pltpu


def _fast_gelu(x):
    # HF ACT2FN['gelu_fast'] = FastGELUActivation:
    # 0.5 * x * (1 + tanh(x * 0.7978845608 * (1 + 0.044715 * x * x)))
    return 0.5 * x * (1.0 + jnp.tanh(x * 0.7978845608028654 * (1.0 + 0.044715 * x * x)))


def mlp_kernel(x_ref, wg_ref, wu_ref, wd_ref, o_ref, acc_ref):
    k = pl.program_id(1)

    @pl.when(k == 0)
    def _():
        acc_ref[...] = jnp.zeros_like(acc_ref)

    x = x_ref[...]                                              # (tm, H)   bf16
    g = jnp.dot(x, wg_ref[...],                                 # (tm, tI)  f32, MXU
                preferred_element_type=jnp.float32)
    u = jnp.dot(x, wu_ref[...],                                 # (tm, tI)  f32, MXU
                preferred_element_type=jnp.float32)
    h = (_fast_gelu(g) * u).astype(wd_ref.dtype)                # (tm, tI)  VPU/EUP -> bf16
    acc_ref[...] += jnp.dot(h, wd_ref[...],                     # (tm, H)   f32, MXU
                            preferred_element_type=jnp.float32)

    @pl.when(k == pl.num_programs(1) - 1)
    def _():
        o_ref[...] = acc_ref[...].astype(o_ref.dtype)


def _round_up(x, m):
    return (x + m - 1) // m * m


def _default_vmem_budget_bytes():
    """~80% of physical VMEM (leaves headroom for compiler-internal scratch)."""
    phys = 64 * 1024 * 1024  # conservative fallback (v7x-sized)
    try:
        phys = pltpu.get_tpu_info().vmem_capacity_bytes
    except Exception:
        pass
    return int(phys * 0.8)


def _footprint_bytes(tm, ti, H, compute_itemsize=2, out_itemsize=2):
    """Double-buffered block + accumulator footprint for one grid step."""
    dbl = 2
    return (dbl * tm * H * compute_itemsize            # x tile
            + dbl * H * ti * compute_itemsize * 2      # gate + up weight tiles
            + dbl * ti * H * compute_itemsize          # down weight tile
            + dbl * tm * H * out_itemsize              # output tile (bf16)
            + tm * H * 4)                              # f32 accumulator (single-buffered)


def _choose_tiles(M, H, I, vmem_budget_bytes):
    """Pick (tm, ti) that fit the VMEM budget.

    tm is adaptive to M (decode pads only to a multiple of 32 rows) and capped at 512
    (beyond the ~650-700 flops/byte balance point there is little to gain); ti grows to
    the largest power-of-two multiple of 128 that still fits double-buffered.
    """
    tm = min(512, max(32, _round_up(M, 32)))
    while tm > 32 and _footprint_bytes(tm, 128, H) > vmem_budget_bytes:
        tm //= 2
    ti = 128
    ti_cap = min(2048, _round_up(I, 128))
    while ti * 2 <= ti_cap and _footprint_bytes(tm, ti * 2, H) <= vmem_budget_bytes:
        ti *= 2
    return tm, ti


def prepare_weights(w_gate, w_up, w_down, *, ti, compute_dtype=jnp.bfloat16):
    """One-time (load-time) weight prep: cast to bf16 and pad I to a multiple of ti.

    Zero padding is an exact no-op: gelu_fast(0)*0 == 0 and zero down-proj rows
    contribute nothing.  Do this once, not per forward call.
    """
    H, I = w_gate.shape
    i_pad = _round_up(I, ti)
    wg = w_gate.astype(compute_dtype)
    wu = w_up.astype(compute_dtype)
    wd = w_down.astype(compute_dtype)
    if i_pad != I:
        wg = jnp.pad(wg, ((0, 0), (0, i_pad - I)))
        wu = jnp.pad(wu, ((0, 0), (0, i_pad - I)))
        wd = jnp.pad(wd, ((0, i_pad - I), (0, 0)))
    return wg, wu, wd


def deepseek_v3_mlp(x, w_gate, w_up, w_down, *, tm=None, ti=None,
                    compute_dtype=jnp.bfloat16, out_dtype=None,
                    vmem_limit_bytes=None):
    """x: (M, hidden); w_gate/w_up: (hidden, inter); w_down: (inter, hidden).

    Weights are (in_features, out_features), i.e. the transpose of torch.nn.Linear.weight.
    Tile sizes / VMEM limit are derived per-generation from the detected VMEM capacity
    unless given explicitly.  Output is bf16 unless `out_dtype` says otherwise.
    """
    M, H = x.shape
    I = w_gate.shape[1]
    assert H % 128 == 0, "hidden_size must be a multiple of the 128-lane width"

    if vmem_limit_bytes is None:
        vmem_limit_bytes = _default_vmem_budget_bytes()
    auto_tm, auto_ti = _choose_tiles(M, H, I, vmem_limit_bytes)
    tm = auto_tm if tm is None else tm
    ti = auto_ti if ti is None else ti
    out_dtype = compute_dtype if out_dtype is None else out_dtype

    m_pad = _round_up(M, tm)

    # Activations: cast only if needed (upstream should already hand us bf16), pad only
    # if needed.  Zero token rows are exact no-ops and are sliced off below.
    xc = x if x.dtype == compute_dtype else x.astype(compute_dtype)
    if m_pad != M:
        xc = jnp.pad(xc, ((0, m_pad - M), (0, 0)))

    # Weight prep (cast + I-padding).  In a real model call prepare_weights() once at
    # load time and pass the prepped arrays here; this path is a no-op re-cast then.
    wg, wu, wd = prepare_weights(w_gate, w_up, w_down, ti=ti, compute_dtype=compute_dtype)
    i_pad = wg.shape[1]

    m_tiles = m_pad // tm
    nk = i_pad // ti
    grid = (m_tiles, nk)

    itemsize = jnp.dtype(compute_dtype).itemsize
    cost = pl.CostEstimate(
        flops=6 * m_pad * H * i_pad,                    # 2*M*H*I each for gate, up, down
        transcendentals=m_pad * i_pad,                  # one tanh per intermediate element
        bytes_accessed=(xc.size * itemsize
                        + (wg.size + wu.size + wd.size) * itemsize * m_tiles  # re-streamed per token tile
                        + m_pad * H * jnp.dtype(out_dtype).itemsize),
    )

    # TODO(synk): on v7x with a single token tile (decode), split the k reduction or the
    # H output columns across the two TensorCores with per-core partial accumulators.
    out = pl.pallas_call(
        mlp_kernel,
        out_shape=jax.ShapeDtypeStruct((m_pad, H), out_dtype),
        grid_spec=pltpu.PrefetchScalarGridSpec(
            num_scalar_prefetch=0,
            grid=grid,
            in_specs=[
                pl.BlockSpec((tm, H), lambda i, k: (i, 0)),   # x row tile
                pl.BlockSpec((H, ti), lambda i, k: (0, k)),   # gate-proj I-tile (no repack)
                pl.BlockSpec((H, ti), lambda i, k: (0, k)),   # up-proj I-tile   (no repack)
                pl.BlockSpec((ti, H), lambda i, k: (k, 0)),   # down-proj I-tile
            ],
            out_specs=pl.BlockSpec((tm, H), lambda i, k: (i, 0)),
            scratch_shapes=[pltpu.VMEM((tm, H), jnp.float32)],  # f32 accumulator
        ),
        compiler_params=pltpu.CompilerParams(
            dimension_semantics=("parallel", "arbitrary"),
            vmem_limit_bytes=int(vmem_limit_bytes),
        ),
        cost_estimate=cost,
    )(xc, wg, wu, wd)

    return out[:M] if m_pad != M else out


def reference(x, w_gate, w_up, w_down):
    # Mimics the kernel's numerics: bf16 operands, f32 accumulation, bf16 hidden product.
    f32 = jnp.float32
    xb = x.astype(jnp.bfloat16).astype(f32)
    wg = w_gate.astype(jnp.bfloat16).astype(f32)
    wu = w_up.astype(jnp.bfloat16).astype(f32)
    wd = w_down.astype(jnp.bfloat16).astype(f32)
    g = xb @ wg
    u = xb @ wu
    h = (_fast_gelu(g) * u).astype(jnp.bfloat16).astype(f32)
    return h @ wd


if __name__ == "__main__":
    # Small, module-consistent shapes: hidden_size=256, intermediate_size=512,
    # batch=2, seq=128 -> 256 flattened tokens.  tm=128, ti=256 exercises both
    # grid axes (2 token tiles x 2 reduction tiles).
    hidden_size = 256
    intermediate_size = 512
    batch, seq = 2, 128

    key = jax.random.PRNGKey(0)
    kx, kg, ku, kd = jax.random.split(key, 4)

    x = jax.random.normal(kx, (batch, seq, hidden_size), dtype=jnp.float32)
    # Deterministic "Linear" weights (no bias), stored as (in, out) = W.T of torch Linear.
    w_gate = jax.random.normal(kg, (hidden_size, intermediate_size), dtype=jnp.float32) * 0.02
    w_up = jax.random.normal(ku, (hidden_size, intermediate_size), dtype=jnp.float32) * 0.02
    w_down = jax.random.normal(kd, (intermediate_size, hidden_size), dtype=jnp.float32) * 0.02

    x2d = x.reshape(batch * seq, hidden_size)

    out = deepseek_v3_mlp(x2d, w_gate, w_up, w_down, tm=128, ti=256)
    out = jax.block_until_ready(out)

    ref = reference(x2d, w_gate, w_up, w_down)
    assert out.shape == (batch * seq, hidden_size)
    assert jnp.allclose(out.astype(jnp.float32), ref, atol=5e-3, rtol=5e-2), "mismatch vs reference"

    # Also exercise the auto-tiling path (decode-sized M with adaptive tm).
    out_small = deepseek_v3_mlp(x2d[:3], w_gate, w_up, w_down)
    out_small = jax.block_until_ready(out_small)
    assert out_small.shape == (3, hidden_size)
    assert jnp.allclose(out_small.astype(jnp.float32), ref[:3], atol=5e-3, rtol=5e-2), \
        "mismatch vs reference (decode path)"

    out3d = out.reshape(batch, seq, hidden_size)  # restore (batch, seq, hidden)
    jax.block_until_ready(out3d)
    print("KERNEL_OK")
</pallas_src>

<mosaic_0001>
module attributes {stable_mosaic.version = 11 : i64} {
  func.func @mlp_kernel(%arg0: i32, %arg1: i32, %arg2: memref<128x256xbf16, #tpu.memory_space<vmem>>, %arg3: memref<256x256xbf16, #tpu.memory_space<vmem>>, %arg4: memref<256x256xbf16, #tpu.memory_space<vmem>>, %arg5: memref<256x256xbf16, #tpu.memory_space<vmem>>, %arg6: memref<128x256xbf16, #tpu.memory_space<vmem>>, %arg7: memref<128x256xf32, #tpu.memory_space<vmem>>) attributes {dimension_semantics = [#tpu.dimension_semantics<parallel>, #tpu.dimension_semantics<arbitrary>], iteration_bounds = array<i64: 2, 2>, scalar_prefetch = 0 : i64, scratch_operands = 1 : i64, tpu.core_type = #tpu.core_type<tc>, window_params = [{transform_indices = @transform_0, window_bounds = array<i64: 128, 256>}, {transform_indices = @transform_1, window_bounds = array<i64: 256, 256>}, {transform_indices = @transform_2, window_bounds = array<i64: 256, 256>}, {transform_indices = @transform_3, window_bounds = array<i64: 256, 256>}, {transform_indices = @transform_4, window_bounds = array<i64: 128, 256>}]} {
    %c0_i32 = arith.constant 0 : i32
    %0 = arith.cmpi eq, %arg1, %c0_i32 : i32
    %1 = arith.extui %0 : i1 to i32
    %c0_i32_0 = arith.constant 0 : i32
    %2 = arith.cmpi ne, %1, %c0_i32_0 : i32
    scf.if %2 {
      %cst_20 = arith.constant 0.000000e+00 : f32
      %32 = vector.broadcast %cst_20 : f32 to vector<128x256xf32>
      %c0_21 = arith.constant 0 : index
      %c0_22 = arith.constant 0 : index
      %33 = vector.load %arg7[%c0_21, %c0_22] : memref<128x256xf32, #tpu.memory_space<vmem>>, vector<128x256xf32>
      tpu.vector_store %arg7[%c0_21, %c0_22], %32 {strides = array<i32>} : memref<128x256xf32, #tpu.memory_space<vmem>>, vector<128x256xf32>,
    } else {
    }
    %c0 = arith.constant 0 : index
    %c0_1 = arith.constant 0 : index
    %3 = vector.load %arg2[%c0, %c0_1] : memref<128x256xbf16, #tpu.memory_space<vmem>>, vector<128x256xbf16>
    %c0_2 = arith.constant 0 : index
    %c0_3 = arith.constant 0 : index
    %4 = vector.load %arg3[%c0_2, %c0_3] : memref<256x256xbf16, #tpu.memory_space<vmem>>, vector<256x256xbf16>
    %cst = arith.constant dense<0.000000e+00> : vector<128x256xf32>
    %5 = tpu.matmul %3, %4, %cst {dimension_numbers = #tpu.dot_dimension_numbers<[1], [0], [0], [1], [0, 0, 1, 1], [], []>} : vector<128x256xbf16>, vector<256x256xbf16>, vector<128x256xf32> -> vector<128x256xf32>
    %c0_4 = arith.constant 0 : index
    %c0_5 = arith.constant 0 : index
    %6 = vector.load %arg4[%c0_4, %c0_5] : memref<256x256xbf16, #tpu.memory_space<vmem>>, vector<256x256xbf16>
    %cst_6 = arith.constant dense<0.000000e+00> : vector<128x256xf32>
    %7 = tpu.matmul %3, %6, %cst_6 {dimension_numbers = #tpu.dot_dimension_numbers<[1], [0], [0], [1], [0, 0, 1, 1], [], []>} : vector<128x256xbf16>, vector<256x256xbf16>, vector<128x256xf32> -> vector<128x256xf32>
    %cst_7 = arith.constant 5.000000e-01 : f32
    %8 = vector.broadcast %cst_7 : f32 to vector<128x256xf32>
    %9 = arith.mulf %8, %5 : vector<128x256xf32>
    %cst_8 = arith.constant 0.797884583 : f32
    %10 = vector.broadcast %cst_8 : f32 to vector<128x256xf32>
    %11 = arith.mulf %5, %10 : vector<128x256xf32>
    %cst_9 = arith.constant 4.471500e-02 : f32
    %12 = vector.broadcast %cst_9 : f32 to vector<128x256xf32>
    %13 = arith.mulf %12, %5 : vector<128x256xf32>
    %14 = arith.mulf %13, %5 : vector<128x256xf32>
    %cst_10 = arith.constant 1.000000e+00 : f32
    %15 = vector.broadcast %cst_10 : f32 to vector<128x256xf32>
    %16 = arith.addf %15, %14 : vector<128x256xf32>
    %17 = arith.mulf %11, %16 : vector<128x256xf32>
    %18 = math.tanh %17 : vector<128x256xf32>
    %cst_11 = arith.constant 1.000000e+00 : f32
    %19 = vector.broadcast %cst_11 : f32 to vector<128x256xf32>
    %20 = arith.addf %19, %18 : vector<128x256xf32>
    %21 = arith.mulf %9, %20 : vector<128x256xf32>
    %22 = arith.mulf %21, %7 : vector<128x256xf32>
    %23 = arith.truncf %22 : vector<128x256xf32> to vector<128x256xbf16>
    %c0_12 = arith.constant 0 : index
    %c0_13 = arith.constant 0 : index
    %24 = vector.load %arg7[%c0_12, %c0_13] : memref<128x256xf32, #tpu.memory_space<vmem>>, vector<128x256xf32>
    %c0_14 = arith.constant 0 : index
    %c0_15 = arith.constant 0 : index
    %25 = vector.load %arg5[%c0_14, %c0_15] : memref<256x256xbf16, #tpu.memory_space<vmem>>, vector<256x256xbf16>
    %cst_16 = arith.constant dense<0.000000e+00> : vector<128x256xf32>
    %26 = tpu.matmul %23, %25, %cst_16 {dimension_numbers = #tpu.dot_dimension_numbers<[1], [0], [0], [1], [0, 0, 1, 1], [], []>} : vector<128x256xbf16>, vector<256x256xbf16>, vector<128x256xf32> -> vector<128x256xf32>
    %27 = arith.addf %24, %26 : vector<128x256xf32>
    %c0_17 = arith.constant 0 : index
    %c0_18 = arith.constant 0 : index
    %28 = vector.load %arg7[%c0_17, %c0_18] : memref<128x256xf32, #tpu.memory_space<vmem>>, vector<128x256xf32>
    tpu.vector_store %arg7[%c0_17, %c0_18], %27 {strides = array<i32>} : memref<128x256xf32, #tpu.memory_space<vmem>>, vector<128x256xf32>,
    %c1_i32 = arith.constant 1 : i32
    %29 = arith.cmpi eq, %arg1, %c1_i32 : i32
    %30 = arith.extui %29 : i1 to i32
    %c0_i32_19 = arith.constant 0 : i32
    %31 = arith.cmpi ne, %30, %c0_i32_19 : i32
    scf.if %31 {
      %c0_20 = arith.constant 0 : index
      %c0_21 = arith.constant 0 : index
      %32 = vector.load %arg7[%c0_20, %c0_21] : memref<128x256xf32, #tpu.memory_space<vmem>>, vector<128x256xf32>
      %33 = arith.truncf %32 : vector<128x256xf32> to vector<128x256xbf16>
      %c0_22 = arith.constant 0 : index
      %c0_23 = arith.constant 0 : index
      %34 = vector.load %arg6[%c0_22, %c0_23] : memref<128x256xbf16, #tpu.memory_space<vmem>>, vector<128x256xbf16>
      tpu.vector_store %arg6[%c0_22, %c0_23], %33 {strides = array<i32>} : memref<128x256xbf16, #tpu.memory_space<vmem>>, vector<128x256xbf16>,
    } else {
    }
    return
  }
  func.func @transform_0(%arg0: i32, %arg1: i32) -> (i32, i32) {
    %c0_i32 = arith.constant 0 : i32
    %c0_i32_0 = arith.constant 0 : i32
    return %arg0, %c0_i32 : i32, i32
  }
  func.func @transform_1(%arg0: i32, %arg1: i32) -> (i32, i32) {
    %c0_i32 = arith.constant 0 : i32
    %c0_i32_0 = arith.constant 0 : i32
    return %c0_i32, %arg1 : i32, i32
  }
  func.func @transform_2(%arg0: i32, %arg1: i32) -> (i32, i32) {
    %c0_i32 = arith.constant 0 : i32
    %c0_i32_0 = arith.constant 0 : i32
    return %c0_i32, %arg1 : i32, i32
  }
  func.func @transform_3(%arg0: i32, %arg1: i32) -> (i32, i32) {
    %c0_i32 = arith.constant 0 : i32
    %c0_i32_0 = arith.constant 0 : i32
    return %arg1, %c0_i32 : i32, i32
  }
  func.func @transform_4(%arg0: i32, %arg1: i32) -> (i32, i32) {
    %c0_i32 = arith.constant 0 : i32
    %c0_i32_0 = arith.constant 0 : i32
    return %arg0, %c0_i32 : i32, i32
  }
}

</mosaic_0001>

<bundles_post_ra>
// kernel: tpu_custom_call.1
= control target key start
LH: loop header
LB: loop body
LE: loop exit
PB: predicated region body
PF: predicated region fallthrough
CT: control target
= control target key end

     0   :  { %s4260_s0 = inlined_call_operand.hbm [shape: bf16[256,256], index: 0, kind: input, shape index: {}]   ;;  %s4261_s1 = inlined_call_operand.hbm [shape: bf16[256,512], index: 1, kind: input, shape index: {}]   ;;  %s4262_s2 = inlined_call_operand.hbm [shape: bf16[256,512], index: 2, kind: input, shape index: {}]   ;;  %s4263_s3 = inlined_call_operand.hbm [shape: bf16[512,256], index: 3, kind: input, shape index: {}]   ;;  %s4264_s4 = inlined_call_operand.hbm [shape: bf16[256,256], index: 4, kind: output, shape index: {}]  }
   0x1   :  { %4282 = sst [smem:[#allocation30_spill]] %s4260_s0 }
   0x2   :  { %4283 = sst [smem:[#allocation31_spill]] %s4261_s1 }
   0x3   :  { %4284 = sst [smem:[#allocation32_spill]] %s4262_s2 }
   0x4   :  { %4285 = sst [smem:[#allocation33_spill]] %s4264_s4 }
   0x5   :  { %9 = vsyncpa [#allocation4], 0 }
   0x6   :  { %11 = vsyncpa [#allocation4 + $0x1], 0 }
   0x7   :  { %12 = vsyncpa [#allocation7], 0 }
   0x8   :  { %14 = vsyncpa [#allocation7 + $0x1], 0 }
   0x9   :  { %15 = vsyncpa [#allocation10], 0 }
   0xa   :  { %17 = vsyncpa [#allocation10 + $0x1], 0 }
   0xb   :  { %18 = vsyncpa [#allocation5], 0 }
   0xc   :  { %20 = vsyncpa [#allocation5 + $0x1], 0  ;;  %s3393_s15 = smov 0   ;;  %s3395_s16 = smov 0  }
   0xd   :  { %s3397_s17 = smov 0   ;;  %s3399_s18 = smov 0  }
   0xe   :  { %s3401_s19 = smov 0   ;;  %s3403_s20 = smov 0  }
   0xf   :  { %s3405_s21 = smov 0   ;;  %s3407_s22 = smov 0  }
  0x10   :  { %s3409_s23 = smov 0   ;;  %s3411_s24 = smov 0  }
  0x11   :  { %s3413_s25 = smov 0  }
  0x12 LB: > { %4286 = sst [smem:[#allocation16_spill]] %s3332_s18  ;;  %s35_s26 = sadd.s32 1, %s3352_s23  ;;  %s3360_s25 = sphi %s3413_s25, %s26_s25   ;;  %s3356_s24 = sphi %s3411_s24, %s4330_s24   ;;  %s3352_s23 = sphi %s3409_s23, %s4337_s23   ;;  %s3348_s22 = sphi %s3407_s22, %s4328_s22   ;;  %s3344_s21 = sphi %s3405_s21, %s4336_s21   ;;  %s3340_s20 = sphi %s3403_s20, %s4327_s20   ;;  %s3336_s19 = sphi %s3401_s19, %s4335_s19   ;;  %s3332_s18 = sphi %s3399_s18, %s4334_s18   ;;  %s3328_s17 = sphi %s3397_s17, %s4333_s17   ;;  %s3324_s16 = sphi %s3395_s16, %s4332_s16   ;;  %s3320_s15 = sphi %s3393_s15, %s4331_s15  }
  0x13   : > { %4287 = sst [smem:[#allocation17_spill]] %s3340_s20  ;;  %p53_p0 = scmp.eq.s32.totalorder %s3360_s25, 0 }
  0x14   : > { %4288 = sst [smem:[#allocation18_spill]] %s3348_s22  ;;  %p3450_p1 = scmp.ge.s32.totalorder %s35_s26, 2 }
  0x15   : > { %4289 = sst [smem:[#allocation19_spill]] %s3356_s24  ;;  %s71_s28 = sadd.s32 1, %s3328_s17 }
  0x16   : > { %p78_p2 = scmp.ne.s32.totalorder %s3328_s17, %s3324_s16  ;;  %p84_p3 = scmp.ne.s32.totalorder %s3324_s16, %s3320_s15 }
  0x17   : > { %s4339_s26 = smov (%p3450_p1, %s35_s26), 0  ;;  %p2950_p5 = scmp.lt.s32.totalorder %s3360_s25, 4 }
  0x18   : > { %4291 = sst [smem:[#allocation20_spill]] %s4339_s26  ;;  %p3465_p4 = por %p78_p2, %p53_p0 }
  0x19   : > { %s68_s30 = ssub.s32 %s3352_s23, %s4339_s26  ;;  %s209_s5 = sand.u32 1, %s3360_s25  }
  0x1a   : > { %p69_p6 = scmp.eq.s32.totalorder %s68_s30, 0  ;;  %s4266_s7 = sand.u32 1, %s3328_s17  }
  0x1b   : > { %s3479_s8 = sshll.u32 %s4266_s7, 8  ;;  %s2805_s9 = sshll.u32 %s3352_s23, 3 }
  0x1c   : > { %s3474_s6 = scalar_select %p69_p6, %s3328_s17, %s71_s28  }
  0x1d   : > { %s4294_s1 = sld [smem:[#allocation31_spill]]  ;;  %s213_s14 = scalar_lea.vmem [#allocation6], %s3479_s8 }
  0x1e   : > { %4293 = sst [smem:[#allocation21_spill]] %s3474_s6  ;;  %s221_s26 = sshll.u32 %s213_s14, 4  ;;  %s222_s26 = int_to_ptr.vmem [resolvable:$true] %s221_s26 }
  0x1f   : > { %p3490_p7 = pnand %p2950_p5, %p3465_p4  ;;  %s4296_s2 = sld [smem:[#allocation32_spill]] }
  0x20   : > { %p2341_p8 = scmp.ge.s32.totalorder %s3360_s25, 1  ;;  %s3498_s29 = scalar_lea.sflag [#allocation7], %s209_s5 }
  0x21   : > { %s4267_s14 = smov 256   ;;  %s4268_s7 = smov 128  }
  0x22   : > { %p274_p9 = scmp.lt.s32.totalorder %s3360_s25, 5  ;;  %s2324_s30 = sadd.s32 4294967294, %s3360_s25  }
  0x23   : > { %s218_s12 = scalar_lea.hbm %s4294_s1, %s2805_s9  ;;  %s4270_s1 = smov 8  }
  0x24   : > { %s219_s13 = sshll.u32 %s218_s12, 4  ;;  %p3509_p10 = pnand %p2341_p8, %p274_p9  ;;  %s220_s13 = int_to_ptr.hbm [resolvable:$true] %s219_s13 }
  0x25   : > { %s240_s11 = scalar_lea.hbm %s4296_s2, %s2805_s9  ;;  %s3514_s9 = sadd.s32 4294967295, %s3360_s25  }
  0x26   : > { %s241_s12 = sshll.u32 %s240_s11, 4  ;;  %s38_s10 = sadd.s32 1, %s3356_s24  ;;  %s3506_s12 = int_to_ptr.hbm [resolvable:$true] %s241_s12 }
  0x27   : > { %2939 = dma.hbm_to_vmem [thread:$0]  (!%p3490_p7), %s220_s13, 4096, %s222_s26, %s3498_s29, %s4267_s14, %s4268_s7, %s4270_s1  }
  0x28   : > { %s4341_s10 = smov (!%p3450_p1, %s38_s10), %s3356_s24  ;;  %s45_s26 = sadd.s32 1, %s3340_s20 }
  0x29   : > { %p52_p11 = scmp.ne.s32.totalorder %s3340_s20, %s3336_s19  ;;  %p40_p12 = scmp.ge.s32.totalorder %s4341_s10, 2 }
  0x2a   : > { %p58_p13 = scmp.ne.s32.totalorder %s3336_s19, %s3332_s18  ;;  %p59_p4 = scmp.eq.s32.totalorder %s3514_s9, 0 }
  0x2b   : > { %p3528_p2 = por %p53_p0, %p52_p11  ;;  %s4343_s10 = smov (%p40_p12, %s4341_s10), 0 }
  0x2c   : > { %4299 = sst [smem:[#allocation22_spill]] %s4343_s10  ;;  %p3538_p6 = por %p59_p4, %p58_p13 }
  0x2d   : > { %p3545_p1 = por %p84_p3, %p59_p4  ;;  %s42_s14 = ssub.s32 %s3356_s24, %s4343_s10 }
  0x2e   : > { %p160_p0 = scmp.eq.s32.totalorder %s3514_s9, 3  ;;  %p43_p8 = scmp.eq.s32.totalorder %s42_s14, 0 }
  0x2f   : > { %p166_p9 = scmp.eq.s32.totalorder %s2324_s30, 3  ;;  %s186_s1 = sand.u32 1, %s3340_s20  }
  0x30   : > { %p3552_p12 = por %p160_p0, %p52_p11  ;;  %s2327_s10 = sshll.u32 %s186_s1, 7 }
  0x31   : > { %s3558_s2 = scalar_select %p43_p8, %s3340_s20, %s45_s26  }
  0x32   : > { %s4302_s7 = scalar_select %p3552_p12, 1, 0 }
  0x33   : > { %4304 = sst [smem:[#allocation24_spill]] %s3558_s2  ;;  %p3563_p3 = por %p166_p9, %p58_p13 }
  0x34   : > { %4303 = sst [smem:[#allocation23_spill]] %s4302_s7  ;;  %s2804_s6 = sshll.u32 %s3356_s24, 7 }
  0x35   : > { %s4305_s15 = scalar_select %p3563_p3, 1, 0 }
  0x36   : > { %s4307_s0 = sld [smem:[#allocation30_spill]]  ;;  %s190_s22 = scalar_lea.vmem [#allocation3], %s2327_s10 }
  0x37   : > { %4306 = sst [smem:[#allocation25_spill]] %s4305_s15  ;;  %s199_s26 = sshll.u32 %s190_s22, 4  ;;  %s200_s26 = int_to_ptr.vmem [resolvable:$true] %s199_s26 }
  0x38   : > { %p2934_p11 = pnand %p2950_p5, %p3528_p2  ;;  %s235_s2 = scalar_lea.vmem [#allocation8], %s3479_s8 }
  0x39   : > { %s243_s20 = sshll.u32 %s235_s2, 4  ;;  %s187_s15 = scalar_lea.sflag [#allocation4], %s186_s1  ;;  %s244_s20 = int_to_ptr.vmem [resolvable:$true] %s243_s20 }
  0x3a   : > { %s4308_s24 = smov 8   ;;  %s4309_s18 = smov 128  }
  0x3b   : > { %s2808_s22 = sshll.u32 %s3352_s23, 8  ;;  %s257_s14 = scalar_lea.vmem [#allocation9], %s3479_s8 }
  0x3c   : > { %s196_s4 = scalar_lea.hbm %s4307_s0, %s2804_s6  ;;  %s263_s13 = scalar_lea.hbm %s4263_s3, %s2808_s22 }
  0x3d   : > { %s197_s7 = sshll.u32 %s196_s4, 4  ;;  %s4310_s4 = smov 256   ;;  %s198_s7 = int_to_ptr.hbm [resolvable:$true] %s197_s7 }
  0x3e   : > { %2936 = dma.hbm_to_vmem [thread:$0]  (!%p2934_p11), %s198_s7, 2048, %s200_s26, %s187_s15, %s4309_s18, %s4309_s18, %s4308_s24  }
  0x3f   : > { %2942 = dma.hbm_to_vmem [thread:$0]  (!%p3490_p7), %s3506_s12, 4096, %s244_s20, %s3498_s29, %s4310_s4, %s4309_s18, %s4308_s24  }
  0x40   : > { %s266_s30 = sshll.u32 %s257_s14, 4  ;;  %s264_s0 = sshll.u32 %s263_s13, 4  ;;  %s267_s30 = int_to_ptr.vmem [resolvable:$true] %s266_s30  ;;  %s265_s0 = int_to_ptr.hbm [resolvable:$true] %s264_s0 }
  0x41   : > { %s4311_s1 = sand.u32 1, %s3328_s17   ;;  %278 = sbr.rel (%p3509_p10) target bundleno = 729 (0x2d9), region = 36 }
  0x42   : > { %s254_s2 = scalar_lea.sflag [#allocation10], %s4311_s1 }
  0x43   : > { %2945 = dma.hbm_to_vmem [thread:$0]  (!%p3490_p7), %s265_s0, 4096, %s267_s30, %s254_s2, %s4309_s18, %s4309_s18, %s4308_s24  }
  0x46   : > { %s3601_s20 = sand.u32 1, %s3336_s19  }
  0x47   : > { %s2342_s7 = sshll.u32 %s3601_s20, 7  ;;  %s281_s8 = scalar_lea.sflag [#allocation4], %s3601_s20 }
  0x48   : > { %s3605_s12 = scalar_lea.vmem [#allocation3], %s2342_s7 }
  0x49   : > { %3303 = dma.done.wait (%p3538_p6), %s281_s8, 2048  }
  0x4a   : > { %3305 = vsyncadd (%p3538_p6), %s281_s8, 4294965248  ;;  %s290_s0 = sand.u32 1, %s3514_s9   ;;  %s292_s18 = sand.u32 1, %s3324_s16  }
  0x4b   : > { %s2343_s24 = sshll.u32 %s292_s18, 8  ;;  %s291_s28 = scalar_lea.sflag [#allocation7], %s290_s0 }
  0x4c   : > { %s3613_s29 = scalar_lea.vmem [#allocation6], %s2343_s24 }
  0x4d   : > { %3307 = dma.done.wait (%p3545_p1), %s291_s28, 8192  }
  0x4e   : > { %3309 = vsyncadd (%p3545_p1), %s291_s28, 4294959104  ;;  %s3619_s5 = scalar_lea.vmem [#allocation8], %s2343_s24  ;;  %s311_s15 = scalar_lea.sflag [#allocation10], %s292_s18 }
  0x4f   : > { %s3621_s27 = scalar_lea.vmem [#allocation9], %s2343_s24 }
  0x50   : > { %3311 = dma.done.wait (%p3545_p1), %s311_s15, 4096  }
  0x51   : > { %3313 = vsyncadd (%p3545_p1), %s311_s15, 4294963200  ;;  %s3627_s9 = scalar_lea.vmem [#allocation11], %s2342_s7  ;;  %p2347_p5 = scmp.ne.s32.totalorder %s3344_s21, 0 }
  0x53   : > { %363 = sbr.rel (%p2347_p5) target bundleno = 121 (0x79), region = 56 }
  0x58   : > { %v3365_v0 = vmov 0.0  }
  0x59   : > { %364 = vst [vmem:[#allocation2 + $0xb0] sm:$0xff] %v3365_v0 }
  0x5a   : > { %365 = vst [vmem:[#allocation2] sm:$0xff] %v3365_v0 }
  0x5b   : > { %366 = vst [vmem:[#allocation2 + $0xd8] sm:$0xff] %v3365_v0 }
  0x5c   : > { %367 = vst [vmem:[#allocation2 + $0x18] sm:$0xff] %v3365_v0 }
  0x5d   : > { %368 = vst [vmem:[#allocation2 + $0x50] sm:$0xff] %v3365_v0 }
  0x5e   : > { %369 = vst [vmem:[#allocation2 + $0x68] sm:$0xff] %v3365_v0 }
  0x5f   : > { %370 = vst [vmem:[#allocation2 + $0x30] sm:$0xff] %v3365_v0 }
  0x60   : > { %371 = vst [vmem:[#allocation2 + $0x48] sm:$0xff] %v3365_v0 }
  0x61   : > { %372 = vst [vmem:[#allocation2 + $0x80] sm:$0xff] %v3365_v0 }
  0x62   : > { %373 = vst [vmem:[#allocation2 + $0x88] sm:$0xff] %v3365_v0 }
  0x63   : > { %374 = vst [vmem:[#allocation2 + $0xe8] sm:$0xff] %v3365_v0 }
  0x64   : > { %375 = vst [vmem:[#allocation2 + $0xb8] sm:$0xff] %v3365_v0 }
  0x65   : > { %376 = vst [vmem:[#allocation2 + $0x60] sm:$0xff] %v3365_v0 }
  0x66   : > { %377 = vst [vmem:[#allocation2 + $0xf0] sm:$0xff] %v3365_v0 }
  0x67   : > { %378 = vst [vmem:[#allocation2 + $0x8] sm:$0xff] %v3365_v0 }
  0x68   : > { %379 = vst [vmem:[#allocation2 + $0x78] sm:$0xff] %v3365_v0 }
  0x69   : > { %380 = vst [vmem:[#allocation2 + $0x38] sm:$0xff] %v3365_v0 }
  0x6a   : > { %381 = vst [vmem:[#allocation2 + $0x58] sm:$0xff] %v3365_v0 }
  0x6b   : > { %382 = vst [vmem:[#allocation2 + $0x40] sm:$0xff] %v3365_v0 }
  0x6c   : > { %383 = vst [vmem:[#allocation2 + $0xc8] sm:$0xff] %v3365_v0 }
  0x6d   : > { %384 = vst [vmem:[#allocation2 + $0xe0] sm:$0xff] %v3365_v0 }
  0x6e   : > { %385 = vst [vmem:[#allocation2 + $0x90] sm:$0xff] %v3365_v0 }
  0x6f   : > { %386 = vst [vmem:[#allocation2 + $0x70] sm:$0xff] %v3365_v0 }
  0x70   : > { %387 = vst [vmem:[#allocation2 + $0xc0] sm:$0xff] %v3365_v0 }
  0x71   : > { %388 = vst [vmem:[#allocation2 + $0xa8] sm:$0xff] %v3365_v0 }
  0x72   : > { %389 = vst [vmem:[#allocation2 + $0xd0] sm:$0xff] %v3365_v0 }
  0x73   : > { %390 = vst [vmem:[#allocation2 + $0x10] sm:$0xff] %v3365_v0 }
  0x74   : > { %391 = vst [vmem:[#allocation2 + $0x28] sm:$0xff] %v3365_v0 }
  0x75   : > { %392 = vst [vmem:[#allocation2 + $0xa0] sm:$0xff] %v3365_v0 }
  0x76   : > { %393 = vst [vmem:[#allocation2 + $0xf8] sm:$0xff] %v3365_v0 }
  0x77   : > { %394 = vst [vmem:[#allocation2 + $0x20] sm:$0xff] %v3365_v0 }
  0x78   : > { %395 = vst [vmem:[#allocation2 + $0x98] sm:$0xff] %v3365_v0 }
  0x79 PF: > { %v2470_v1 = vld [vmem:[%s3613_s29 + $0x70] sm:$0xf]  ;;  %v2840_v2 = vld [vmem:[%s3613_s29 + $0x74] sm:$0xf0]  ;;  %v2839_v6 = vld [vmem:[%s3613_s29 + $0x74] sm:$0xf] }
  0x7a   : > { %v2534_v3 = vld [vmem:[%s3613_s29 + $0xf0] sm:$0xf]  ;;  %v2471_v4 = vor.u32 %v2840_v2, %v2470_v1  ;;  %v2856_v5 = vld [vmem:[%s3613_s29 + $0xf4] sm:$0xf0]  ;;  %v2472_v7 = vld [vmem:[%s3613_s29 + $0x78] sm:$0xf0] }
  0x7b   : > { %v2535_v8 = vor.u32 %v2856_v5, %v2534_v3  ;;  %v2475_v9 = vor.u32 %v2839_v6, %v2472_v7  ;;  %v2855_v10 = vld [vmem:[%s3613_s29 + $0xf4] sm:$0xf]  ;;  %v2536_v11 = vld [vmem:[%s3613_s29 + $0xf8] sm:$0xf0]  ;;  %v2462_v12 = vld [vmem:[%s3613_s29 + $0x60] sm:$0xf] }
  0x7c   : > { %684 = vmatpush.bf16.msra.mxu0 %v2471_v4  ;;  %v2539_v13 = vor.u32 %v2855_v10, %v2536_v11  ;;  %v2838_v14 = vld [vmem:[%s3613_s29 + $0x64] sm:$0xf0]  ;;  %v2526_v15 = vld [vmem:[%s3613_s29 + $0xe0] sm:$0xf]  ;;  %v2837_v19 = vld [vmem:[%s3613_s29 + $0x64] sm:$0xf] }
  0x7d   : > { %v2854_v16 = vld [vmem:[%s3613_s29 + $0xe4] sm:$0xf0]  ;;  %733 = vmatpush.bf16.msra.mxu1 %v2535_v8  ;;  %782 = vmatpush.bf16.msra.mxu2 %v2475_v9  ;;  %v2463_v17 = vor.u32 %v2838_v14, %v2462_v12  ;;  %v2464_v20 = vld [vmem:[%s3613_s29 + $0x68] sm:$0xf0]  ;;  %v2853_v21 = vld [vmem:[%s3613_s29 + $0xe4] sm:$0xf] }
  0x7e   : > { %v2527_v18 = vor.u32 %v2854_v16, %v2526_v15  ;;  %831 = vmatpush.bf16.msra.mxu3 %v2539_v13  ;;  %v2467_v22 = vor.u32 %v2837_v19, %v2464_v20  ;;  %v2528_v23 = vld [vmem:[%s3613_s29 + $0xe8] sm:$0xf0]  ;;  %v2454_v24 = vld [vmem:[%s3613_s29 + $0x50] sm:$0xf]  ;;  %v2836_v25 = vld [vmem:[%s3613_s29 + $0x54] sm:$0xf0] }
  0x7f   : > { %v2531_v26 = vor.u32 %v2853_v21, %v2528_v23  ;;  %v2518_v27 = vld [vmem:[%s3613_s29 + $0xd0] sm:$0xf]  ;;  %v2852_v28 = vld [vmem:[%s3613_s29 + $0xd4] sm:$0xf0]  ;;  %v2835_v29 = vld [vmem:[%s3613_s29 + $0x54] sm:$0xf]  ;;  %v2455_v30 = vor.u32 %v2836_v25, %v2454_v24 }
  0x80   : > { %685 = vmatpush.bf16.msra.mxu0 %v2463_v17  ;;  %v2456_v31 = vld [vmem:[%s3613_s29 + $0x58] sm:$0xf0]  ;;  %v2851_v32 = vld [vmem:[%s3613_s29 + $0xd4] sm:$0xf]  ;;  %v2519_v34 = vor.u32 %v2852_v28, %v2518_v27  ;;  %v2446_v36 = vld [vmem:[%s3613_s29 + $0x40] sm:$0xf] }
  0x81   : > { %v2520_v33 = vld [vmem:[%s3613_s29 + $0xd8] sm:$0xf0]  ;;  %734 = vmatpush.bf16.msra.mxu1 %v2527_v18  ;;  %783 = vmatpush.bf16.msra.mxu2 %v2467_v22  ;;  %v2459_v35 = vor.u32 %v2835_v29, %v2456_v31  ;;  %v2834_v37 = vld [vmem:[%s3613_s29 + $0x44] sm:$0xf0]  ;;  %v2510_v38 = vld [vmem:[%s3613_s29 + $0xc0] sm:$0xf] }
  0x82   : > { %832 = vmatpush.bf16.msra.mxu3 %v2531_v26  ;;  %v2523_v39 = vor.u32 %v2851_v32, %v2520_v33  ;;  %v2850_v40 = vld [vmem:[%s3613_s29 + $0xc4] sm:$0xf0]  ;;  %v2833_v41 = vld [vmem:[%s3613_s29 + $0x44] sm:$0xf]  ;;  %v2448_v42 = vld [vmem:[%s3613_s29 + $0x48] sm:$0xf0]  ;;  %v2447_v45 = vor.u32 %v2834_v37, %v2446_v36 }
  0x83   : > { %v2849_v43 = vld [vmem:[%s3613_s29 + $0xc4] sm:$0xf]  ;;  %v2512_v44 = vld [vmem:[%s3613_s29 + $0xc8] sm:$0xf0]  ;;  %v2511_v46 = vor.u32 %v2850_v40, %v2510_v38  ;;  %v2451_v47 = vor.u32 %v2833_v41, %v2448_v42  ;;  %v2438_v48 = vld [vmem:[%s3613_s29 + $0x30] sm:$0xf] }
  0x84   : > { %686 = vmatpush.bf16.msra.mxu0 %v2455_v30  ;;  %v2832_v49 = vld [vmem:[%s3613_s29 + $0x34] sm:$0xf0]  ;;  %v2502_v50 = vld [vmem:[%s3613_s29 + $0xb0] sm:$0xf]  ;;  %v2515_v51 = vor.u32 %v2849_v43, %v2512_v44  ;;  %v2831_v53 = vld [vmem:[%s3613_s29 + $0x34] sm:$0xf] }
  0x85   : > { %735 = vmatpush.bf16.msra.mxu1 %v2519_v34  ;;  %784 = vmatpush.bf16.msra.mxu2 %v2459_v35  ;;  %v2848_v52 = vld [vmem:[%s3613_s29 + $0xb4] sm:$0xf0]  ;;  %v2440_v54 = vld [vmem:[%s3613_s29 + $0x38] sm:$0xf0]  ;;  %v2847_v55 = vld [vmem:[%s3613_s29 + $0xb4] sm:$0xf]  ;;  %v2439_v57 = vor.u32 %v2832_v49, %v2438_v48 }
  0x86   : > { %833 = vmatpush.bf16.msra.mxu3 %v2523_v39  ;;  %v2504_v56 = vld [vmem:[%s3613_s29 + $0xb8] sm:$0xf0]  ;;  %v2503_v58 = vor.u32 %v2848_v52, %v2502_v50  ;;  %v2443_v59 = vor.u32 %v2831_v53, %v2440_v54  ;;  %v2430_v60 = vld [vmem:[%s3613_s29 + $0x20] sm:$0xf]  ;;  %v2830_v61 = vld [vmem:[%s3613_s29 + $0x24] sm:$0xf0] }
  0x87   : > { %v2494_v62 = vld [vmem:[%s3613_s29 + $0xa0] sm:$0xf]  ;;  %v2507_v63 = vor.u32 %v2847_v55, %v2504_v56  ;;  %v2846_v0 = vld [vmem:[%s3613_s29 + $0xa4] sm:$0xf0]  ;;  %v2829_v1 = vld [vmem:[%s3613_s29 + $0x24] sm:$0xf]  ;;  %v2431_v5 = vor.u32 %v2830_v61, %v2430_v60 }
  0x88   : > { %687 = vmatpush.bf16.msra.mxu0 %v2447_v45  ;;  %v2432_v2 = vld [vmem:[%s3613_s29 + $0x28] sm:$0xf0]  ;;  %v2845_v3 = vld [vmem:[%s3613_s29 + $0xa4] sm:$0xf]  ;;  %v2495_v6 = vor.u32 %v2846_v0, %v2494_v62  ;;  %v2422_v8 = vld [vmem:[%s3613_s29 + $0x10] sm:$0xf] }
  0x89   : > { %736 = vmatpush.bf16.msra.mxu1 %v2511_v46  ;;  %785 = vmatpush.bf16.msra.mxu2 %v2451_v47  ;;  %v2496_v4 = vld [vmem:[%s3613_s29 + $0xa8] sm:$0xf0]  ;;  %v2435_v7 = vor.u32 %v2829_v1, %v2432_v2  ;;  %v2828_v9 = vld [vmem:[%s3613_s29 + $0x14] sm:$0xf0]  ;;  %v2486_v10 = vld [vmem:[%s3613_s29 + $0x90] sm:$0xf] }
  0x8a   : > { %834 = vmatpush.bf16.msra.mxu3 %v2515_v51  ;;  %v2499_v11 = vor.u32 %v2845_v3, %v2496_v4  ;;  %v2844_v12 = vld [vmem:[%s3613_s29 + $0x94] sm:$0xf0]  ;;  %v2827_v13 = vld [vmem:[%s3613_s29 + $0x14] sm:$0xf]  ;;  %v2424_v14 = vld [vmem:[%s3613_s29 + $0x18] sm:$0xf0]  ;;  %v2423_v17 = vor.u32 %v2828_v9, %v2422_v8 }
  0x8b   : > { %v2843_v15 = vld [vmem:[%s3613_s29 + $0x94] sm:$0xf]  ;;  %v2488_v16 = vld [vmem:[%s3613_s29 + $0x98] sm:$0xf0]  ;;  %v2414_v18 = vld [vmem:[%s3613_s29] sm:$0xf]  ;;  %v2487_v20 = vor.u32 %v2844_v12, %v2486_v10  ;;  %v2427_v21 = vor.u32 %v2827_v13, %v2424_v14 }
  0x8c   : > { %688 = vmatpush.bf16.msra.mxu0 %v2439_v57  ;;  %v2826_v19 = vld [vmem:[%s3613_s29 + $0x4] sm:$0xf0]  ;;  %v2478_v22 = vld [vmem:[%s3613_s29 + $0x80] sm:$0xf]  ;;  %v2825_v24 = vld [vmem:[%s3613_s29 + $0x4] sm:$0xf]  ;;  %v2491_v25 = vor.u32 %v2843_v15, %v2488_v16 }
  0x8d   : > { %737 = vmatpush.bf16.msra.mxu1 %v2503_v58  ;;  %786 = vmatpush.bf16.msra.mxu2 %v2443_v59  ;;  %v2842_v23 = vld [vmem:[%s3613_s29 + $0x84] sm:$0xf0]  ;;  %v2416_v26 = vld [vmem:[%s3613_s29 + $0x8] sm:$0xf0]  ;;  %v2841_v27 = vld [vmem:[%s3613_s29 + $0x84] sm:$0xf]  ;;  %v2415_v32 = vor.u32 %v2826_v19, %v2414_v18 }
  0x8e   : > { %835 = vmatpush.bf16.msra.mxu3 %v2507_v63  ;;  %v2480_v28 = vld [vmem:[%s3613_s29 + $0x88] sm:$0xf0]  ;;  %v2350_v29 = vld [vmem:[%s3605_s12] sm:$0xf]  ;;  %v2871_v30 = vld [vmem:[%s3619_s5 + $0x74] sm:$0xf]  ;;  %v2479_v36 = vor.u32 %v2842_v23, %v2478_v22  ;;  %v2419_v37 = vor.u32 %v2825_v24, %v2416_v26 }
  0x8f   : > { %v2600_v31 = vld [vmem:[%s3619_s5 + $0x78] sm:$0xf0]  ;;  %v2810_v33 = vld [vmem:[%s3605_s12 + $0x4] sm:$0xf0]  ;;  %v2887_v34 = vld [vmem:[%s3619_s5 + $0xf4] sm:$0xf]  ;;  %v2483_v40 = vor.u32 %v2841_v27, %v2480_v28 }
  0x90   : > { %689 = vmatpush.bf16.msra.mxu0 %v2431_v5  ;;  %v2664_v35 = vld [vmem:[%s3619_s5 + $0xf8] sm:$0xf0]  ;;  %v2809_v38 = vld [vmem:[%s3605_s12 + $0x4] sm:$0xf]  ;;  %v2352_v39 = vld [vmem:[%s3605_s12 + $0x8] sm:$0xf0]  ;;  %v2603_v41 = vor.u32 %v2871_v30, %v2600_v31  ;;  %v3705_v45 = vor.u32 %v2810_v33, %v2350_v29 }
  0x91   : > { %738 = vmatpush.bf16.msra.mxu1 %v2495_v6  ;;  %787 = vmatpush.bf16.msra.mxu2 %v2435_v7  ;;  %v2598_v42 = vld [vmem:[%s3619_s5 + $0x70] sm:$0xf]  ;;  %v2872_v43 = vld [vmem:[%s3619_s5 + $0x74] sm:$0xf0]  ;;  %v2667_v46 = vor.u32 %v2887_v34, %v2664_v35  ;;  %v2869_v48 = vld [vmem:[%s3619_s5 + $0x64] sm:$0xf]  ;;  %v3710_v50 = vor.u32 %v2809_v38, %v2352_v39 }
  0x92   : > { %836 = vmatpush.bf16.msra.mxu3 %v2499_v11  ;;  %v2662_v44 = vld [vmem:[%s3619_s5 + $0xf0] sm:$0xf]  ;;  %v2888_v47 = vld [vmem:[%s3619_s5 + $0xf4] sm:$0xf0]  ;;  %v2592_v49 = vld [vmem:[%s3619_s5 + $0x68] sm:$0xf0]  ;;  %v2599_v53 = vor.u32 %v2872_v43, %v2598_v42 }
  0x93   : > { %v2885_v51 = vld [vmem:[%s3619_s5 + $0xe4] sm:$0xf]  ;;  %v2656_v52 = vld [vmem:[%s3619_s5 + $0xe8] sm:$0xf0]  ;;  %v2663_v54 = vor.u32 %v2888_v47, %v2662_v44  ;;  %v2595_v55 = vor.u32 %v2869_v48, %v2592_v49  ;;  %v2590_v56 = vld [vmem:[%s3619_s5 + $0x60] sm:$0xf] }
  0x94   : > { %690 = vmatpush.bf16.msra.mxu0 %v2423_v17  ;;  %v2870_v57 = vld [vmem:[%s3619_s5 + $0x64] sm:$0xf0]  ;;  %v2659_v58 = vor.u32 %v2885_v51, %v2656_v52  ;;  %v2654_v59 = vld [vmem:[%s3619_s5 + $0xe0] sm:$0xf]  ;;  %v2867_v62 = vld [vmem:[%s3619_s5 + $0x54] sm:$0xf] }
  0x95   : > { %739 = vmatpush.bf16.msra.mxu1 %v2487_v20  ;;  %788 = vmatpush.bf16.msra.mxu2 %v2427_v21  ;;  %v2886_v60 = vld [vmem:[%s3619_s5 + $0xe4] sm:$0xf0]  ;;  %v2591_v61 = vor.u32 %v2870_v57, %v2590_v56  ;;  %v2584_v63 = vld [vmem:[%s3619_s5 + $0x58] sm:$0xf0]  ;;  %v2883_v0 = vld [vmem:[%s3619_s5 + $0xd4] sm:$0xf] }
  0x96   : > { %837 = vmatpush.bf16.msra.mxu3 %v2491_v25  ;;  %v2655_v1 = vor.u32 %v2886_v60, %v2654_v59  ;;  %v2587_v2 = vor.u32 %v2867_v62, %v2584_v63  ;;  %v2648_v3 = vld [vmem:[%s3619_s5 + $0xd8] sm:$0xf0]  ;;  %v2582_v4 = vld [vmem:[%s3619_s5 + $0x50] sm:$0xf]  ;;  %v2868_v5 = vld [vmem:[%s3619_s5 + $0x54] sm:$0xf0] }
  0x97   : > { %v2651_v6 = vor.u32 %v2883_v0, %v2648_v3  ;;  %v2646_v7 = vld [vmem:[%s3619_s5 + $0xd0] sm:$0xf]  ;;  %v2884_v8 = vld [vmem:[%s3619_s5 + $0xd4] sm:$0xf0]  ;;  %v2583_v9 = vor.u32 %v2868_v5, %v2582_v4  ;;  %v2811_v13 = vld [vmem:[%s3605_s12 + $0x14] sm:$0xf] }
  0x98   : > { %691 = vmatpush.bf16.msra.mxu0 %v2415_v32  ;;  %v2647_v10 = vor.u32 %v2884_v8, %v2646_v7  ;;  %v2358_v11 = vld [vmem:[%s3605_s12 + $0x10] sm:$0xf]  ;;  %v2812_v12 = vld [vmem:[%s3605_s12 + $0x14] sm:$0xf0]  ;;  %v2360_v14 = vld [vmem:[%s3605_s12 + $0x18] sm:$0xf0] }
  0x99   : > { %740 = vmatpush.bf16.msra.mxu1 %v2479_v36  ;;  %789 = vmatpush.bf16.msra.mxu2 %v2419_v37  ;;  %v3734_v15 = vor.u32 %v2812_v12, %v2358_v11  ;;  %v3736_v16 = vor.u32 %v2811_v13, %v2360_v14  ;;  %v2865_v17 = vld [vmem:[%s3619_s5 + $0x44] sm:$0xf]  ;;  %v2576_v18 = vld [vmem:[%s3619_s5 + $0x48] sm:$0xf0]  ;;  %v2574_v22 = vld [vmem:[%s3619_s5 + $0x40] sm:$0xf] }
  0x9a   : > { %838 = vmatpush.bf16.msra.mxu3 %v2483_v40  ;;  %v2881_v19 = vld [vmem:[%s3619_s5 + $0xc4] sm:$0xf]  ;;  %v2579_v20 = vor.u32 %v2865_v17, %v2576_v18  ;;  %v2640_v21 = vld [vmem:[%s3619_s5 + $0xc8] sm:$0xf0]  ;;  %v2866_v23 = vld [vmem:[%s3619_s5 + $0x44] sm:$0xf0] }
  0x9b   : > { %692 = vmatmul.bf16.vlgmr.msra.gmra.mxu0 %v3705_v45  ;;  %v2643_v24 = vor.u32 %v2881_v19, %v2640_v21  ;;  %v2575_v25 = vor.u32 %v2866_v23, %v2574_v22  ;;  %v2638_v26 = vld [vmem:[%s3619_s5 + $0xc0] sm:$0xf]  ;;  %v2882_v27 = vld [vmem:[%s3619_s5 + $0xc4] sm:$0xf0]  ;;  %v2813_v31 = vld [vmem:[%s3605_s12 + $0x24] sm:$0xf] }
  0x9c   : > { %741 = vmatmul.bf16.vlgmr.msra.gmra.mxu1 %v3710_v50  ;;  %790 = vmatmul.bf16.vlgmr.msra.gmra.mxu2 %v3705_v45  ;;  %v2639_v28 = vor.u32 %v2882_v27, %v2638_v26  ;;  %v2366_v29 = vld [vmem:[%s3605_s12 + $0x20] sm:$0xf]  ;;  %v2814_v30 = vld [vmem:[%s3605_s12 + $0x24] sm:$0xf0]  ;;  %v2368_v32 = vld [vmem:[%s3605_s12 + $0x28] sm:$0xf0] }
  0x9d   : > { %1170 = vmatpush.bf16.msrb.mxu2 %v2603_v41  ;;  %839 = vmatmul.bf16.vlgmr.msra.gmra.mxu3 %v3710_v50  ;;  %v3754_v33 = vor.u32 %v2814_v30, %v2366_v29  ;;  %v3756_v34 = vor.u32 %v2813_v31, %v2368_v32  ;;  %v2863_v35 = vld [vmem:[%s3619_s5 + $0x34] sm:$0xf]  ;;  %v2568_v36 = vld [vmem:[%s3619_s5 + $0x38] sm:$0xf0]  ;;  %v2566_v40 = vld [vmem:[%s3619_s5 + $0x30] sm:$0xf] }
  0x9e   : > { %1219 = vmatpush.bf16.msrb.mxu3 %v2667_v46  ;;  %1072 = vmatpush.bf16.msrb.mxu0 %v2599_v53  ;;  %v2879_v37 = vld [vmem:[%s3619_s5 + $0xb4] sm:$0xf]  ;;  %v2571_v38 = vor.u32 %v2863_v35, %v2568_v36  ;;  %v2632_v39 = vld [vmem:[%s3619_s5 + $0xb8] sm:$0xf0]  ;;  %v2864_v41 = vld [vmem:[%s3619_s5 + $0x34] sm:$0xf0] }
  0x9f   : > { %1121 = vmatpush.bf16.msrb.mxu1 %v2663_v54  ;;  %v2635_v42 = vor.u32 %v2879_v37, %v2632_v39  ;;  %v2567_v43 = vor.u32 %v2864_v41, %v2566_v40  ;;  %v2630_v44 = vld [vmem:[%s3619_s5 + $0xb0] sm:$0xf]  ;;  %v2880_v46 = vld [vmem:[%s3619_s5 + $0xb4] sm:$0xf0]  ;;  %v2815_v51 = vld [vmem:[%s3605_s12 + $0x34] sm:$0xf] }
  0xa0   : > { %v2631_v47 = vor.u32 %v2880_v46, %v2630_v44  ;;  %v2374_v48 = vld [vmem:[%s3605_s12 + $0x30] sm:$0xf]  ;;  %v2816_v49 = vld [vmem:[%s3605_s12 + $0x34] sm:$0xf0]  ;;  %v2376_v52 = vld [vmem:[%s3605_s12 + $0x38] sm:$0xf0] }
  0xa1   : > { %1171 = vmatpush.bf16.msrb.mxu2 %v2595_v55  ;;  %v3774_v53 = vor.u32 %v2816_v49, %v2374_v48  ;;  %v3776_v54 = vor.u32 %v2815_v51, %v2376_v52  ;;  %v2861_v55 = vld [vmem:[%s3619_s5 + $0x24] sm:$0xf]  ;;  %v2560_v56 = vld [vmem:[%s3619_s5 + $0x28] sm:$0xf0]  ;;  %v2558_v60 = vld [vmem:[%s3619_s5 + $0x20] sm:$0xf] }
  0xa2   : > { %1220 = vmatpush.bf16.msrb.mxu3 %v2659_v58  ;;  %1073 = vmatpush.bf16.msrb.mxu0 %v2591_v61  ;;  %v2877_v57 = vld [vmem:[%s3619_s5 + $0xa4] sm:$0xf]  ;;  %v2563_v58 = vor.u32 %v2861_v55, %v2560_v56  ;;  %v2624_v59 = vld [vmem:[%s3619_s5 + $0xa8] sm:$0xf0]  ;;  %v2862_v61 = vld [vmem:[%s3619_s5 + $0x24] sm:$0xf0] }
  0xa3   : > { %1122 = vmatpush.bf16.msrb.mxu1 %v2655_v1  ;;  %v2627_v62 = vor.u32 %v2877_v57, %v2624_v59  ;;  %v2559_v63 = vor.u32 %v2862_v61, %v2558_v60  ;;  %v2622_v0 = vld [vmem:[%s3619_s5 + $0xa0] sm:$0xf]  ;;  %v2878_v1 = vld [vmem:[%s3619_s5 + $0xa4] sm:$0xf0]  ;;  %v2817_v5 = vld [vmem:[%s3605_s12 + $0x44] sm:$0xf] }
  0xa4   : > { %v2382_v3 = vld [vmem:[%s3605_s12 + $0x40] sm:$0xf]  ;;  %v2818_v4 = vld [vmem:[%s3605_s12 + $0x44] sm:$0xf0]  ;;  %v2875_v11 = vld [vmem:[%s3619_s5 + $0x94] sm:$0xf] }
  0xa5   : > { %1172 = vmatpush.bf16.msrb.mxu2 %v2587_v2  ;;  %v2623_v2 = vor.u32 %v2878_v1, %v2622_v0  ;;  %v3794_v7 = vor.u32 %v2818_v4, %v2382_v3  ;;  %v2616_v13 = vld [vmem:[%s3619_s5 + $0x98] sm:$0xf0]  ;;  %v2550_v14 = vld [vmem:[%s3619_s5 + $0x10] sm:$0xf]  ;;  %v2860_v17 = vld [vmem:[%s3619_s5 + $0x14] sm:$0xf0] }
  0xa6   : > { %1221 = vmatpush.bf16.msrb.mxu3 %v2651_v6  ;;  %1074 = vmatpush.bf16.msrb.mxu0 %v2583_v9  ;;  %v2384_v6 = vld [vmem:[%s3605_s12 + $0x48] sm:$0xf0]  ;;  %v2859_v9 = vld [vmem:[%s3619_s5 + $0x14] sm:$0xf]  ;;  %v2619_v18 = vor.u32 %v2875_v11, %v2616_v13  ;;  %v2551_v19 = vor.u32 %v2860_v17, %v2550_v14  ;;  %v2876_v21 = vld [vmem:[%s3619_s5 + $0x94] sm:$0xf0] }
  0xa7   : > { %1123 = vmatpush.bf16.msrb.mxu1 %v2647_v10  ;;  %v3796_v8 = vor.u32 %v2817_v5, %v2384_v6  ;;  %v2552_v10 = vld [vmem:[%s3619_s5 + $0x18] sm:$0xf0]  ;;  %v2390_v23 = vld [vmem:[%s3605_s12 + $0x50] sm:$0xf]  ;;  %v2857_v29 = vld [vmem:[%s3619_s5 + $0x4] sm:$0xf] }
  0xa8   : > { %v2555_v12 = vor.u32 %v2859_v9, %v2552_v10  ;;  %v2392_v26 = vld [vmem:[%s3605_s12 + $0x58] sm:$0xf0]  ;;  %v2544_v30 = vld [vmem:[%s3619_s5 + $0x8] sm:$0xf0]  ;;  %v2873_v31 = vld [vmem:[%s3619_s5 + $0x84] sm:$0xf] }
  0xa9   : > { %1173 = vmatpush.bf16.msrb.mxu2 %v2579_v20  ;;  %v2614_v20 = vld [vmem:[%s3619_s5 + $0x90] sm:$0xf]  ;;  %v2547_v32 = vor.u32 %v2857_v29, %v2544_v30  ;;  %v2608_v35 = vld [vmem:[%s3619_s5 + $0x88] sm:$0xf0]  ;;  %v2542_v36 = vld [vmem:[%s3619_s5] sm:$0xf] }
  0xaa   : > { %1222 = vmatpush.bf16.msrb.mxu3 %v2643_v24  ;;  %1075 = vmatpush.bf16.msrb.mxu0 %v2575_v25  ;;  %v2615_v22 = vor.u32 %v2876_v21, %v2614_v20  ;;  %v2820_v24 = vld [vmem:[%s3605_s12 + $0x54] sm:$0xf0]  ;;  %v2819_v25 = vld [vmem:[%s3605_s12 + $0x54] sm:$0xf]  ;;  %v2858_v37 = vld [vmem:[%s3619_s5 + $0x4] sm:$0xf0] }
  0xab   : > { %697 = vmatmul.bf16.gmra.mxu0 %v3734_v15  ;;  %1124 = vmatpush.bf16.msrb.mxu1 %v2639_v28  ;;  %v3814_v27 = vor.u32 %v2820_v24, %v2390_v23  ;;  %v3816_v28 = vor.u32 %v2819_v25, %v2392_v26  ;;  %v2543_v39 = vor.u32 %v2858_v37, %v2542_v36  ;;  %v2606_v40 = vld [vmem:[%s3619_s5 + $0x80] sm:$0xf]  ;;  %v2874_v41 = vld [vmem:[%s3619_s5 + $0x84] sm:$0xf0]  ;;  %v2821_v46 = vld [vmem:[%s3605_s12 + $0x64] sm:$0xf] }
  0xac   : > { %746 = vmatmul.bf16.gmra.mxu1 %v3736_v16  ;;  %795 = vmatmul.bf16.gmra.mxu2 %v3734_v15  ;;  %v2822_v44 = vld [vmem:[%s3605_s12 + $0x64] sm:$0xf0]  ;;  %v2406_v51 = vld [vmem:[%s3605_s12 + $0x70] sm:$0xf]  ;;  %v2824_v52 = vld [vmem:[%s3605_s12 + $0x74] sm:$0xf0] }
  0xad   : > { %844 = vmatmul.bf16.gmra.mxu3 %v3736_v16  ;;  %1174 = vmatpush.bf16.msrb.mxu2 %v2571_v38  ;;  %v2611_v38 = vor.u32 %v2873_v31, %v2608_v35  ;;  %v2823_v55 = vld [vmem:[%s3605_s12 + $0x74] sm:$0xf]  ;;  %v2408_v56 = vld [vmem:[%s3605_s12 + $0x78] sm:$0xf0]  ;;  %v3846_v57 = vor.u32 %v2824_v52, %v2406_v51  ;;  %v2904_v3 = vld [vmem:[%s3621_s27 + $0x74] sm:$0xf0] }
  0xae   : > { %1223 = vmatpush.bf16.msrb.mxu3 %v2635_v42  ;;  %1076 = vmatpush.bf16.msrb.mxu0 %v2567_v43  ;;  %v2607_v42 = vor.u32 %v2874_v41, %v2606_v40  ;;  %v2398_v43 = vld [vmem:[%s3605_s12 + $0x60] sm:$0xf]  ;;  %v2903_v59 = vld [vmem:[%s3621_s27 + $0x74] sm:$0xf]  ;;  %v2728_v60 = vld [vmem:[%s3621_s27 + $0x78] sm:$0xf0] }
  0xaf   : > { %1125 = vmatpush.bf16.msrb.mxu1 %v2631_v47  ;;  %v2400_v47 = vld [vmem:[%s3605_s12 + $0x68] sm:$0xf0]  ;;  %v3834_v48 = vor.u32 %v2822_v44, %v2398_v43  ;;  %v2919_v61 = vld [vmem:[%s3621_s27 + $0xf4] sm:$0xf]  ;;  %v2790_v4 = vld [vmem:[%s3621_s27 + $0xf0] sm:$0xf] }
  0xb0   : > { %v3836_v49 = vor.u32 %v2821_v46, %v2400_v47  ;;  %v2920_v9 = vld [vmem:[%s3621_s27 + $0xf4] sm:$0xf0]  ;;  %v2901_v17 = vld [vmem:[%s3621_s27 + $0x64] sm:$0xf]  ;;  %v2784_v23 = vld [vmem:[%s3621_s27 + $0xe8] sm:$0xf0] }
  0xb1   : > { %1175 = vmatpush.bf16.msrb.mxu2 %v2563_v58  ;;  %v3848_v58 = vor.u32 %v2823_v55, %v2408_v56  ;;  %v2791_v11 = vor.u32 %v2920_v9, %v2790_v4  ;;  %v2718_v29 = vld [vmem:[%s3621_s27 + $0x60] sm:$0xf]  ;;  %v2902_v30 = vld [vmem:[%s3621_s27 + $0x64] sm:$0xf0]  ;;  %v2899_v43 = vld [vmem:[%s3621_s27 + $0x54] sm:$0xf] }
  0xb2   : > { %1224 = vmatpush.bf16.msrb.mxu3 %v2627_v62  ;;  %1077 = vmatpush.bf16.msrb.mxu0 %v2559_v63  ;;  %v2731_v62 = vor.u32 %v2903_v59, %v2728_v60  ;;  %v2792_v63 = vld [vmem:[%s3621_s27 + $0xf8] sm:$0xf0]  ;;  %v2719_v35 = vor.u32 %v2902_v30, %v2718_v29  ;;  %v2782_v36 = vld [vmem:[%s3621_s27 + $0xe0] sm:$0xf]  ;;  %v2918_v37 = vld [vmem:[%s3621_s27 + $0xe4] sm:$0xf0] }
  0xb3   : > { %1126 = vmatpush.bf16.msrb.mxu1 %v2623_v2  ;;  %v2795_v0 = vor.u32 %v2919_v61, %v2792_v63  ;;  %v2726_v2 = vld [vmem:[%s3621_s27 + $0x70] sm:$0xf]  ;;  %v2712_v44 = vld [vmem:[%s3621_s27 + $0x58] sm:$0xf0]  ;;  %v2915_v52 = vld [vmem:[%s3621_s27 + $0xd4] sm:$0xf] }
  0xb4   : > { %v2727_v6 = vor.u32 %v2904_v3, %v2726_v2  ;;  %v2715_v51 = vor.u32 %v2899_v43, %v2712_v44  ;;  %v2776_v55 = vld [vmem:[%s3621_s27 + $0xd8] sm:$0xf0]  ;;  %v2710_v61 = vld [vmem:[%s3621_s27 + $0x50] sm:$0xf]  ;;  %v2916_v3 = vld [vmem:[%s3621_s27 + $0xd4] sm:$0xf0] }
  0xb5   : > { %1176 = vmatpush.bf16.msrb.mxu2 %v2555_v12  ;;  %v2774_v2 = vld [vmem:[%s3621_s27 + $0xd0] sm:$0xf]  ;;  %v2696_v43 = vld [vmem:[%s3621_s27 + $0x38] sm:$0xf0]  ;;  %p2796_p7 = scmp.ne.s32.totalorder %s3344_s21, 1 }
  0xb6   : > { %1225 = vmatpush.bf16.msrb.mxu3 %v2619_v18  ;;  %1078 = vmatpush.bf16.msrb.mxu0 %v2551_v19  ;;  %v2720_v18 = vld [vmem:[%s3621_s27 + $0x68] sm:$0xf0] }
  0xb7   : > { %1127 = vmatpush.bf16.msrb.mxu1 %v2615_v22  ;;  %v2723_v21 = vor.u32 %v2901_v17, %v2720_v18  ;;  %v2917_v22 = vld [vmem:[%s3621_s27 + $0xe4] sm:$0xf] }
  0xb9   : > { %1177 = vmatpush.bf16.msrb.mxu2 %v2547_v32 }
  0xba   : > { %1226 = vmatpush.bf16.msrb.mxu3 %v2611_v38  ;;  %1079 = vmatpush.bf16.msrb.mxu0 %v2543_v39  ;;  %v2783_v39 = vor.u32 %v2918_v37, %v2782_v36 }
  0xbb   : > { %702 = vmatmul.bf16.gmra.mxu0 %v3754_v33  ;;  %1128 = vmatpush.bf16.msrb.mxu1 %v2607_v42 }
  0xbc   : > { %751 = vmatmul.bf16.gmra.mxu1 %v3756_v34  ;;  %800 = vmatmul.bf16.gmra.mxu2 %v3754_v33 }
  0xbd   : > { %849 = vmatmul.bf16.gmra.mxu3 %v3756_v34  ;;  %1926 = vmatpush.bf16.msra.mxu2 %v2731_v62  ;;  %v2900_v62 = vld [vmem:[%s3621_s27 + $0x54] sm:$0xf0] }
  0xbe   : > { %1975 = vmatpush.bf16.msra.mxu3 %v2795_v0  ;;  %1828 = vmatpush.bf16.msra.mxu0 %v2727_v6 }
  0xbf   : > { %1877 = vmatpush.bf16.msra.mxu1 %v2791_v11 }
  0xc1   : > { %1927 = vmatpush.bf16.msra.mxu2 %v2723_v21  ;;  %v2768_v21 = vld [vmem:[%s3621_s27 + $0xc8] sm:$0xf0] }
  0xc2   : > { %1829 = vmatpush.bf16.msra.mxu0 %v2719_v35  ;;  %v2914_v35 = vld [vmem:[%s3621_s27 + $0xc4] sm:$0xf0] }
  0xc3   : > { %1878 = vmatpush.bf16.msra.mxu1 %v2783_v39 }
  0xc5   : > { %1928 = vmatpush.bf16.msra.mxu2 %v2715_v51 }
  0xcb   : > { %707 = vmatmul.bf16.gmra.mxu0 %v3774_v53 }
  0xcc   : > { %756 = vmatmul.bf16.gmra.mxu1 %v3776_v54  ;;  %805 = vmatmul.bf16.gmra.mxu2 %v3774_v53 }
  0xcd   : > { %854 = vmatmul.bf16.gmra.mxu3 %v3776_v54 }
  0xdb   : > { %712 = vmatmul.bf16.gmra.mxu0 %v3794_v7 }
  0xdc   : > { %761 = vmatmul.bf16.gmra.mxu1 %v3796_v8  ;;  %810 = vmatmul.bf16.gmra.mxu2 %v3794_v7 }
  0xdd   : > { %859 = vmatmul.bf16.gmra.mxu3 %v3796_v8 }
  0xeb   : > { %717 = vmatmul.bf16.gmra.mxu0 %v3814_v27 }
  0xec   : > { %766 = vmatmul.bf16.gmra.mxu1 %v3816_v28  ;;  %815 = vmatmul.bf16.gmra.mxu2 %v3814_v27 }
  0xed   : > { %864 = vmatmul.bf16.gmra.mxu3 %v3816_v28 }
  0xfb   : > { %722 = vmatmul.bf16.gmra.mxu0 %v3834_v48 }
  0xfc   : > { %771 = vmatmul.bf16.gmra.mxu1 %v3836_v49  ;;  %820 = vmatmul.bf16.gmra.mxu2 %v3834_v48 }
  0xfd   : > { %869 = vmatmul.bf16.gmra.mxu3 %v3836_v49 }
 0x10b   : > { %727 = vmatmul.bf16.gmra.mxu0 %v3846_v57 }
 0x10c   : > { %776 = vmatmul.bf16.gmra.mxu1 %v3848_v58  ;;  %825 = vmatmul.bf16.gmra.mxu2 %v3846_v57 }
 0x10d   : > { %874 = vmatmul.bf16.gmra.mxu3 %v3848_v58 }
 0x118   : > { %v693_v1 = vpop.f32.mrf.mxu0 }
 0x119   : > { %v742_v5 = vpop.f32.mrf.mxu1 }
 0x11a   : > { %v3862_v10 = vadd.f32 %v742_v5, %v693_v1  ;;  %v2711_v1 = vor.u32 %v2900_v62, %v2710_v61  ;;  %v2775_v5 = vor.u32 %v2916_v3, %v2774_v2  ;;  %v2896_v61 = vld [vmem:[%s3621_s27 + $0x34] sm:$0xf0]  ;;  %v2758_v2 = vld [vmem:[%s3621_s27 + $0xb0] sm:$0xf] }
 0x11b   : > { %1080 = vmatmul.bf16.vlgmr.msrb.gmra.mxu0 %v3705_v45  ;;  %v2912_v3 = vld [vmem:[%s3621_s27 + $0xb4] sm:$0xf0] }
 0x11c   : > { %1129 = vmatmul.bf16.vlgmr.msrb.gmra.mxu1 %v3710_v50  ;;  %1178 = vmatmul.bf16.vlgmr.msrb.gmra.mxu2 %v3705_v45 }
 0x11d   : > { %1227 = vmatmul.bf16.vlgmr.msrb.gmra.mxu3 %v3710_v50  ;;  %v2787_v50 = vor.u32 %v2917_v22, %v2784_v23  ;;  %1830 = vmatpush.bf16.msra.mxu0 %v2711_v1 }
 0x11e   : > { %1879 = vmatpush.bf16.msra.mxu1 %v2775_v5 }
 0x11f   : > { %v791_v12 = vpop.f32.mrf.mxu2  ;;  %1976 = vmatpush.bf16.msra.mxu3 %v2787_v50 }
 0x120   : > { %v840_v13 = vpop.f32.mrf.mxu3  ;;  %v695_v14 = vpop.f32.mrf.mxu0 }
 0x121   : > { %v3870_v19 = vadd.f32 %v840_v13, %v791_v12  ;;  %v744_v20 = vpop.f32.mrf.mxu1  ;;  %v2897_v12 = vld [vmem:[%s3621_s27 + $0x44] sm:$0xf]  ;;  %v2704_v13 = vld [vmem:[%s3621_s27 + $0x48] sm:$0xf0] }
 0x122   : > { %v3874_v45 = vadd.f32 %v744_v20, %v695_v14  ;;  %v2707_v18 = vor.u32 %v2897_v12, %v2704_v13  ;;  %v2913_v20 = vld [vmem:[%s3621_s27 + $0xc4] sm:$0xf] }
 0x123   : > { %v2893_v13 = vld [vmem:[%s3621_s27 + $0x24] sm:$0xf] }
 0x124   : > { %1929 = vmatpush.bf16.msra.mxu2 %v2707_v18 }
 0x127   : > { %v793_v24 = vpop.f32.mrf.mxu2 }
 0x128   : > { %v842_v25 = vpop.f32.mrf.mxu3  ;;  %v698_v26 = vpop.f32.mrf.mxu0 }
 0x129   : > { %v3878_v31 = vadd.f32 %v842_v25, %v793_v24  ;;  %v747_v32 = vpop.f32.mrf.mxu1  ;;  %v2702_v24 = vld [vmem:[%s3621_s27 + $0x40] sm:$0xf]  ;;  %v2898_v25 = vld [vmem:[%s3621_s27 + $0x44] sm:$0xf0] }
 0x12a   : > { %v3882_v38 = vadd.f32 %v747_v32, %v698_v26  ;;  %v2703_v30 = vor.u32 %v2898_v25, %v2702_v24  ;;  %v2766_v32 = vld [vmem:[%s3621_s27 + $0xc0] sm:$0xf]  ;;  %v2894_v25 = vld [vmem:[%s3621_s27 + $0x24] sm:$0xf0] }
 0x12b   : > { %1085 = vmatmul.bf16.gmra.mxu0 %v3734_v15  ;;  %v2767_v37 = vor.u32 %v2914_v35, %v2766_v32  ;;  %v2686_v24 = vld [vmem:[%s3621_s27 + $0x20] sm:$0xf]  ;;  %v2910_v35 = vld [vmem:[%s3621_s27 + $0xa4] sm:$0xf0] }
 0x12c   : > { %1134 = vmatmul.bf16.gmra.mxu1 %v3736_v16  ;;  %1183 = vmatmul.bf16.gmra.mxu2 %v3734_v15  ;;  %v2750_v32 = vld [vmem:[%s3621_s27 + $0xa0] sm:$0xf] }
 0x12d   : > { %1232 = vmatmul.bf16.gmra.mxu3 %v3736_v16  ;;  %v2779_v16 = vor.u32 %v2915_v52, %v2776_v55  ;;  %1831 = vmatpush.bf16.msra.mxu0 %v2703_v30  ;;  %v2911_v52 = vld [vmem:[%s3621_s27 + $0xb4] sm:$0xf]  ;;  %v2760_v55 = vld [vmem:[%s3621_s27 + $0xb8] sm:$0xf0]  ;;  %v2687_v30 = vor.u32 %v2894_v25, %v2686_v24  ;;  %v2670_v25 = vld [vmem:[%s3621_s27] sm:$0xf] }
 0x12e   : > { %1880 = vmatpush.bf16.msra.mxu1 %v2767_v37 }
 0x12f   : > { %v796_v40 = vpop.f32.mrf.mxu2  ;;  %1977 = vmatpush.bf16.msra.mxu3 %v2779_v16 }
 0x130   : > { %v845_v41 = vpop.f32.mrf.mxu3  ;;  %v700_v42 = vpop.f32.mrf.mxu0 }
 0x131   : > { %v3890_v46 = vadd.f32 %v845_v41, %v796_v40  ;;  %v749_v47 = vpop.f32.mrf.mxu1 }
 0x132   : > { %v3894_v15 = vadd.f32 %v749_v47, %v700_v42  ;;  %v2895_v42 = vld [vmem:[%s3621_s27 + $0x34] sm:$0xf] }
 0x133   : > { %v2699_v51 = vor.u32 %v2895_v42, %v2696_v43  ;;  %v2891_v43 = vld [vmem:[%s3621_s27 + $0x14] sm:$0xf] }
 0x135   : > { %1930 = vmatpush.bf16.msra.mxu2 %v2699_v51 }
 0x137   : > { %v798_v56 = vpop.f32.mrf.mxu2 }
 0x138   : > { %v847_v59 = vpop.f32.mrf.mxu3  ;;  %v703_v60 = vpop.f32.mrf.mxu0 }
 0x139   : > { %v3898_v63 = vadd.f32 %v847_v59, %v798_v56  ;;  %v752_v0 = vpop.f32.mrf.mxu1 }
 0x13a   : > { %v3902_v4 = vadd.f32 %v752_v0, %v703_v60  ;;  %v2694_v60 = vld [vmem:[%s3621_s27 + $0x30] sm:$0xf] }
 0x13b   : > { %1090 = vmatmul.bf16.gmra.mxu0 %v3754_v33  ;;  %v2695_v1 = vor.u32 %v2896_v61, %v2694_v60  ;;  %v2678_v60 = vld [vmem:[%s3621_s27 + $0x10] sm:$0xf]  ;;  %v2892_v61 = vld [vmem:[%s3621_s27 + $0x14] sm:$0xf0] }
 0x13c   : > { %1139 = vmatmul.bf16.gmra.mxu1 %v3756_v34  ;;  %1188 = vmatmul.bf16.gmra.mxu2 %v3754_v33 }
 0x13d   : > { %1237 = vmatmul.bf16.gmra.mxu3 %v3756_v34  ;;  %v2771_v34 = vor.u32 %v2913_v20, %v2768_v21  ;;  %1832 = vmatpush.bf16.msra.mxu0 %v2695_v1  ;;  %v2679_v1 = vor.u32 %v2892_v61, %v2678_v60  ;;  %v1333_v60 = vmul.f32 0.044715, %v3870_v19  ;;  %v1300_v61 = vmul.f32 0.7978846, %v3862_v10 }
 0x13f   : > { %v801_v6 = vpop.f32.mrf.mxu2  ;;  %1978 = vmatpush.bf16.msra.mxu3 %v2771_v34  ;;  %v2752_v34 = vld [vmem:[%s3621_s27 + $0xa8] sm:$0xf0] }
 0x140   : > { %v850_v9 = vpop.f32.mrf.mxu3  ;;  %v705_v11 = vpop.f32.mrf.mxu0 }
 0x141   : > { %v3910_v14 = vadd.f32 %v850_v9, %v801_v6  ;;  %v754_v17 = vpop.f32.mrf.mxu1  ;;  %v2759_v6 = vor.u32 %v2912_v3, %v2758_v2  ;;  %1833 = vmatpush.bf16.msra.mxu0 %v2687_v30  ;;  %v2742_v2 = vld [vmem:[%s3621_s27 + $0x90] sm:$0xf]  ;;  %v2908_v3 = vld [vmem:[%s3621_s27 + $0x94] sm:$0xf0]  ;;  %v2890_v30 = vld [vmem:[%s3621_s27 + $0x4] sm:$0xf0] }
 0x142   : > { %v3914_v33 = vadd.f32 %v754_v17, %v705_v11  ;;  %v2688_v17 = vld [vmem:[%s3621_s27 + $0x28] sm:$0xf0] }
 0x143   : > { %1881 = vmatpush.bf16.msra.mxu1 %v2759_v6  ;;  %v2691_v21 = vor.u32 %v2893_v13, %v2688_v17  ;;  %v2889_v13 = vld [vmem:[%s3621_s27 + $0x4] sm:$0xf]  ;;  %v2672_v17 = vld [vmem:[%s3621_s27 + $0x8] sm:$0xf0] }
 0x145   : > { %1931 = vmatpush.bf16.msra.mxu2 %v2691_v21  ;;  %1834 = vmatpush.bf16.msra.mxu0 %v2679_v1  ;;  %v1335_v1 = vmul.f32 0.044715, %v3878_v31 }
 0x147   : > { %v803_v22 = vpop.f32.mrf.mxu2 }
 0x148   : > { %v852_v23 = vpop.f32.mrf.mxu3  ;;  %v708_v50 = vpop.f32.mrf.mxu0 }
 0x149   : > { %v3918_v26 = vadd.f32 %v852_v23, %v803_v22  ;;  %v757_v29 = vpop.f32.mrf.mxu1 }
 0x14a   : > { %v3922_v36 = vadd.f32 %v757_v29, %v708_v50 }
 0x14b   : > { %1095 = vmatmul.bf16.gmra.mxu0 %v3774_v53 }
 0x14c   : > { %1144 = vmatmul.bf16.gmra.mxu1 %v3776_v54  ;;  %1193 = vmatmul.bf16.gmra.mxu2 %v3774_v53 }
 0x14d   : > { %1242 = vmatmul.bf16.gmra.mxu3 %v3776_v54  ;;  %v2763_v54 = vor.u32 %v2911_v52, %v2760_v55 }
 0x14f   : > { %v806_v39 = vpop.f32.mrf.mxu2  ;;  %1979 = vmatpush.bf16.msra.mxu3 %v2763_v54  ;;  %v2744_v54 = vld [vmem:[%s3621_s27 + $0x98] sm:$0xf0] }
 0x150   : > { %v855_v40 = vpop.f32.mrf.mxu3  ;;  %v710_v41 = vpop.f32.mrf.mxu0 }
 0x151   : > { %v3930_v44 = vadd.f32 %v855_v40, %v806_v39  ;;  %v759_v47 = vpop.f32.mrf.mxu1  ;;  %v2751_v39 = vor.u32 %v2910_v35, %v2750_v32  ;;  %v1334_v32 = vmul.f32 0.044715, %v3874_v45  ;;  %v2671_v35 = vor.u32 %v2890_v30, %v2670_v25 }
 0x152   : > { %v3934_v53 = vadd.f32 %v759_v47, %v710_v41  ;;  %v2680_v47 = vld [vmem:[%s3621_s27 + $0x18] sm:$0xf0]  ;;  %v1338_v30 = vmul.f32 0.044715, %v3894_v15 }
 0x153   : > { %1882 = vmatpush.bf16.msra.mxu1 %v2751_v39  ;;  %v2683_v55 = vor.u32 %v2891_v43, %v2680_v47  ;;  %v2734_v39 = vld [vmem:[%s3621_s27 + $0x80] sm:$0xf]  ;;  %1835 = vmatpush.bf16.msra.mxu0 %v2671_v35 }
 0x155   : > { %1932 = vmatpush.bf16.msra.mxu2 %v2683_v55 }
 0x157   : > { %v808_v16 = vpop.f32.mrf.mxu2 }
 0x158   : > { %v857_v56 = vpop.f32.mrf.mxu3  ;;  %v713_v59 = vpop.f32.mrf.mxu0 }
 0x159   : > { %v3938_v62 = vadd.f32 %v857_v56, %v808_v16  ;;  %v762_v0 = vpop.f32.mrf.mxu1 }
 0x15a   : > { %v3942_v5 = vadd.f32 %v762_v0, %v713_v59 }
 0x15b   : > { %1100 = vmatmul.bf16.gmra.mxu0 %v3794_v7 }
 0x15c   : > { %1149 = vmatmul.bf16.gmra.mxu1 %v3796_v8  ;;  %1198 = vmatmul.bf16.gmra.mxu2 %v3794_v7  ;;  %v2909_v7 = vld [vmem:[%s3621_s27 + $0xa4] sm:$0xf] }
 0x15d   : > { %1247 = vmatmul.bf16.gmra.mxu3 %v3796_v8  ;;  %v2755_v8 = vor.u32 %v2909_v7, %v2752_v34  ;;  %v2675_v34 = vor.u32 %v2889_v13, %v2672_v17  ;;  %v1367_v13 = vmul.f32 %v1335_v1, %v3878_v31  ;;  %v1304_v1 = vmul.f32 0.7978846, %v3882_v38 }
 0x15f   : > { %v811_v9 = vpop.f32.mrf.mxu2  ;;  %1980 = vmatpush.bf16.msra.mxu3 %v2755_v8  ;;  %v2905_v8 = vld [vmem:[%s3621_s27 + $0x84] sm:$0xf]  ;;  %1933 = vmatpush.bf16.msra.mxu2 %v2675_v34  ;;  %v1399_v25 = vadd.f32 1.0, %v1367_v13 }
 0x160   : > { %v860_v11 = vpop.f32.mrf.mxu3  ;;  %v3948_v12 = vpop.f32.mrf.mxu0 }
 0x161   : > { %v3952_v18 = vadd.f32 %v860_v11, %v811_v9  ;;  %v3954_v20 = vpop.f32.mrf.mxu1  ;;  %v2743_v9 = vor.u32 %v2908_v3, %v2742_v2  ;;  %v1365_v3 = vmul.f32 %v1333_v60, %v3870_v19 }
 0x163   : > { %1883 = vmatpush.bf16.msra.mxu1 %v2743_v9  ;;  %v1302_v9 = vmul.f32 0.7978846, %v3874_v45 }
 0x167   : > { %v3958_v22 = vpop.f32.mrf.mxu2 }
 0x168   : > { %v3960_v23 = vpop.f32.mrf.mxu3  ;;  %v718_v50 = vpop.f32.mrf.mxu0 }
 0x169   : > { %v767_v29 = vpop.f32.mrf.mxu1 }
 0x16a   : > { %v3966_v37 = vadd.f32 %v767_v29, %v718_v50  ;;  %v2736_v50 = vld [vmem:[%s3621_s27 + $0x88] sm:$0xf0]  ;;  %v1332_v29 = vmul.f32 0.044715, %v3862_v10 }
 0x16b   : > { %1105 = vmatmul.bf16.gmra.mxu0 %v3814_v27 }
 0x16c   : > { %1154 = vmatmul.bf16.gmra.mxu1 %v3816_v28  ;;  %1203 = vmatmul.bf16.gmra.mxu2 %v3814_v27  ;;  %v2907_v27 = vld [vmem:[%s3621_s27 + $0x94] sm:$0xf]  ;;  %v1364_v47 = vmul.f32 %v1332_v29, %v3862_v10  ;;  %v1301_v29 = vmul.f32 0.7978846, %v3870_v19 }
 0x16d   : > { %1252 = vmatmul.bf16.gmra.mxu3 %v3816_v28  ;;  %v2747_v28 = vor.u32 %v2907_v27, %v2744_v54  ;;  %v1366_v54 = vmul.f32 %v1334_v32, %v3874_v45  ;;  %v1303_v32 = vmul.f32 0.7978846, %v3878_v31 }
 0x16f   : > { %v816_v40 = vpop.f32.mrf.mxu2  ;;  %1981 = vmatpush.bf16.msra.mxu3 %v2747_v28  ;;  %v1398_v2 = vadd.f32 1.0, %v1366_v54  ;;  %v1370_v54 = vmul.f32 %v1338_v30, %v3894_v15 }
 0x170   : > { %v865_v41 = vpop.f32.mrf.mxu3  ;;  %v3972_v42 = vpop.f32.mrf.mxu0 }
 0x171   : > { %v3976_v51 = vadd.f32 %v865_v41, %v816_v40  ;;  %v3978_v52 = vpop.f32.mrf.mxu1  ;;  %v2906_v40 = vld [vmem:[%s3621_s27 + $0x84] sm:$0xf0] }
 0x172   : > { %v2735_v43 = vor.u32 %v2906_v40, %v2734_v39 }
 0x174   : > { %1884 = vmatpush.bf16.msra.mxu1 %v2735_v43 }
 0x177   : > { %v3982_v16 = vpop.f32.mrf.mxu2 }
 0x178   : > { %v3984_v56 = vpop.f32.mrf.mxu3  ;;  %v723_v59 = vpop.f32.mrf.mxu0 }
 0x179   : > { %v772_v0 = vpop.f32.mrf.mxu1 }
 0x17a   : > { %v3990_v6 = vadd.f32 %v772_v0, %v723_v59  ;;  %v1396_v0 = vadd.f32 1.0, %v1364_v47 }
 0x17b   : > { %1110 = vmatmul.bf16.gmra.mxu0 %v3834_v48 }
 0x17c   : > { %1159 = vmatmul.bf16.gmra.mxu1 %v3836_v49  ;;  %1208 = vmatmul.bf16.gmra.mxu2 %v3834_v48  ;;  %v1428_v34 = vmul.f32 %v1396_v0, %v1300_v61  ;;  %v1337_v61 = vmul.f32 0.044715, %v3890_v46 }
 0x17d   : > { %1257 = vmatmul.bf16.gmra.mxu3 %v3836_v49  ;;  %v2739_v49 = vor.u32 %v2905_v8, %v2736_v50 }
 0x17e   : > { %3046 = vtanh.f32 %v1428_v34  ;;  %v1306_v34 = vmul.f32 0.7978846, %v3894_v15 }
 0x17f   : > { %v821_v11 = vpop.f32.mrf.mxu2  ;;  %1982 = vmatpush.bf16.msra.mxu3 %v2739_v49  ;;  %v1430_v49 = vmul.f32 %v1398_v2, %v1302_v9  ;;  %v1402_v9 = vadd.f32 1.0, %v1370_v54 }
 0x180   : > { %v870_v21 = vpop.f32.mrf.mxu3  ;;  %v3998_v7 = vpop.f32.mrf.mxu0 }
 0x181   : > { %v4002_v24 = vadd.f32 %v870_v21, %v821_v11  ;;  %v4004_v48 = vpop.f32.mrf.mxu1  ;;  %3048 = vtanh.f32 %v1430_v49  ;;  %v1268_v49 = vmul.f32 0.5, %v3862_v10  ;;  %v1434_v54 = vmul.f32 %v1402_v9, %v1306_v34 }
 0x182   : > { %v1340_v10 = vmul.f32 0.044715, %v3902_v4  ;;  %v1269_v34 = vmul.f32 0.5, %v3870_v19 }
 0x184   : > { %v3047_v60 = vpop.eup %3046 }
 0x185   : > { %v1492_v13 = vadd.f32 1.0, %v3047_v60 }
 0x187   : > { %v4012_v41 = vpop.f32.mrf.mxu2  ;;  %v3049_v0 = vpop.eup %3048  ;;  %v1524_v60 = vmul.f32 %v1492_v13, %v1268_v49  ;;  %v1372_v13 = vmul.f32 %v1340_v10, %v3902_v4 }
 0x188   : > { %v4015_v55 = vpop.f32.mrf.mxu3  ;;  %v728_v27 = vpop.f32.mrf.mxu0 }
 0x189   : > { %v777_v28 = vpop.f32.mrf.mxu1  ;;  %v1404_v19 = vadd.f32 1.0, %v1372_v13  ;;  %v1272_v13 = vmul.f32 0.5, %v3882_v38 }
 0x18a   : > { %v4018_v59 = vadd.f32 %v777_v28, %v728_v27  ;;  %v1431_v27 = vmul.f32 %v1399_v25, %v1303_v32  ;;  %v1270_v32 = vmul.f32 0.5, %v3874_v45 }
 0x18b   : > { %1115 = vmatmul.bf16.gmra.mxu0 %v3846_v57 }
 0x18c   : > { %4312 = vst [vmem:[#allocation26_spill] sm:$0xff] %v4018_v59  ;;  %1164 = vmatmul.bf16.gmra.mxu1 %v3848_v58  ;;  %1213 = vmatmul.bf16.gmra.mxu2 %v3846_v57  ;;  %v1397_v57 = vadd.f32 1.0, %v1365_v3  ;;  %v1339_v3 = vmul.f32 0.044715, %v3898_v63 }
 0x18d   : > { %1262 = vmatmul.bf16.gmra.mxu3 %v3848_v58  ;;  %v1336_v58 = vmul.f32 0.044715, %v3882_v38 }
 0x18e   : > { %v1429_v39 = vmul.f32 %v1397_v57, %v1301_v29  ;;  %v1371_v25 = vmul.f32 %v1339_v3, %v3898_v63 }
 0x18f   : > { %v826_v11 = vpop.f32.mrf.mxu2  ;;  %v1368_v40 = vmul.f32 %v1336_v58, %v3882_v38  ;;  %v1309_v38 = vmul.f32 0.7978846, %v3910_v14 }
 0x190   : > { %v875_v17 = vpop.f32.mrf.mxu3  ;;  %v4030_v21 = vpop.f32.mrf.mxu0  ;;  %3050 = vtanh.f32 %v1429_v39  ;;  %v1403_v59 = vadd.f32 1.0, %v1371_v25  ;;  %v1271_v25 = vmul.f32 0.5, %v3878_v31 }
 0x191   : > { %v4032_v8 = vadd.f32 %v875_v17, %v826_v11  ;;  %v4034_v50 = vpop.f32.mrf.mxu1  ;;  %v1400_v2 = vadd.f32 1.0, %v1368_v40  ;;  %3052 = vtanh.f32 %v1431_v27  ;;  %v1369_v11 = vmul.f32 %v1337_v61, %v3890_v46 }
 0x192   : > { %v1494_v17 = vadd.f32 1.0, %v3049_v0 }
 0x193   : > { %4313 = vst [vmem:[#allocation27_spill] sm:$0xff] %v4032_v8  ;;  %v1432_v39 = vmul.f32 %v1400_v2, %v1304_v1  ;;  %v1401_v61 = vadd.f32 1.0, %v1369_v11  ;;  %v1307_v2 = vmul.f32 0.7978846, %v3898_v63 }
 0x195   : > { %3054 = vtanh.f32 %v1432_v39 }
 0x196   : > { %v3051_v40 = vpop.eup %3050  ;;  %3056 = vtanh.f32 %v1434_v54  ;;  %v1308_v54 = vmul.f32 0.7978846, %v3902_v4 }
 0x197   : > { %v4040_v35 = vpop.f32.mrf.mxu2  ;;  %v3053_v8 = vpop.eup %3052  ;;  %v1493_v45 = vadd.f32 1.0, %v3051_v40 }
 0x198   : > { %4314 = vst [vmem:[#allocation28_spill] sm:$0xff] %v4040_v35  ;;  %v4043_v43 = vpop.f32.mrf.mxu3  ;;  %v1081_v47 = vpop.f32.mrf.mxu0  ;;  %v1305_v35 = vmul.f32 0.7978846, %v3890_v46  ;;  %v1495_v1 = vadd.f32 1.0, %v3053_v8 }
 0x199   : > { %4315 = vst [vmem:[#allocation29_spill] sm:$0xff] %v4043_v43  ;;  %v1130_v28 = vpop.f32.mrf.mxu1  ;;  %v1526_v43 = vmul.f32 %v1494_v17, %v1270_v32  ;;  %v1525_v32 = vmul.f32 %v1493_v45, %v1269_v34 }
 0x19a   : > { %v1131_v58 = vadd.f32 %v1130_v28, %v1081_v47  ;;  %v1342_v28 = vmul.f32 0.044715, %v3914_v33  ;;  %v1433_v11 = vmul.f32 %v1401_v61, %v1305_v35  ;;  %v1527_v40 = vmul.f32 %v1495_v1, %v1271_v25 }
 0x19b   : > { %v3055_v35 = vpop.eup %3054  ;;  %v1436_v1 = vmul.f32 %v1404_v19, %v1308_v54 }
 0x19c   : > { %v1556_v3 = vmul.f32 %v1524_v60, %v1131_v58  ;;  %v1374_v8 = vmul.f32 %v1342_v28, %v3914_v33  ;;  %3058 = vtanh.f32 %v1433_v11  ;;  %v1343_v60 = vmul.f32 0.044715, %v3918_v26 }
 0x19d   : > { %v1496_v10 = vadd.f32 1.0, %v3055_v35  ;;  %v1310_v28 = vmul.f32 0.7978846, %v3914_v33 }
 0x19f   : > { %v1179_v57 = vpop.f32.mrf.mxu2 }
 0x1a0   : > { %v1228_v29 = vpop.f32.mrf.mxu3  ;;  %v1083_v30 = vpop.f32.mrf.mxu0 }
 0x1a1   : > { %v1132_v27 = vpop.f32.mrf.mxu1  ;;  %v1229_v17 = vadd.f32 %v1228_v29, %v1179_v57  ;;  %v3057_v57 = vpop.eup %3056  ;;  %v1341_v29 = vmul.f32 0.044715, %v3910_v14 }
 0x1a2   : > { %v1133_v0 = vadd.f32 %v1132_v27, %v1083_v30  ;;  %v1435_v30 = vmul.f32 %v1403_v59, %v1307_v2  ;;  %v1406_v59 = vadd.f32 1.0, %v1374_v8  ;;  %v3059_v2 = vpop.eup %3058  ;;  %v1528_v8 = vmul.f32 %v1496_v10, %v1272_v13 }
 0x1a3   : > { %v1557_v31 = vmul.f32 %v1525_v32, %v1229_v17  ;;  %v1497_v35 = vadd.f32 1.0, %v3059_v2 }
 0x1a4   : > { %v1558_v47 = vmul.f32 %v1526_v43, %v1133_v0  ;;  %3060 = vtanh.f32 %v1435_v30 }
 0x1a5   : > { %3062 = vtanh.f32 %v1436_v1 }
 0x1a6   : > { %v1588_v9 = vpack.c.bf16 %v1558_v47, %v1556_v3  ;;  %v1498_v3 = vadd.f32 1.0, %v3057_v57  ;;  %v1373_v47 = vmul.f32 %v1341_v29, %v3910_v14  ;;  %v1344_v57 = vmul.f32 0.044715, %v3922_v36 }
 0x1a7   : > { %v1181_v49 = vpop.f32.mrf.mxu2 }
 0x1a8   : > { %v1230_v58 = vpop.f32.mrf.mxu3  ;;  %1836 = vmatmul.bf16.vlgmr.msra.gmra.mxu0 %v1588_v9  ;;  %1934 = vmatmul.bf16.vlgmr.msra.gmra.mxu2 %v1588_v9  ;;  %v1086_v43 = vpop.f32.mrf.mxu0  ;;  %v1375_v9 = vmul.f32 %v1343_v60, %v3918_v26  ;;  %v1273_v60 = vmul.f32 0.5, %v3890_v46  ;;  %v1345_v46 = vmul.f32 0.044715, %v3930_v44 }
 0x1a9   : > { %v1231_v39 = vadd.f32 %v1230_v58, %v1181_v49  ;;  %v1135_v27 = vpop.f32.mrf.mxu1  ;;  %v1274_v49 = vmul.f32 0.5, %v3894_v15  ;;  %v1438_v58 = vmul.f32 %v1406_v59, %v1310_v28  ;;  %v1311_v15 = vmul.f32 0.7978846, %v3918_v26 }
 0x1aa   : > { %v1136_v11 = vadd.f32 %v1135_v27, %v1086_v43  ;;  %v3061_v30 = vpop.eup %3060  ;;  %v1407_v54 = vadd.f32 1.0, %v1375_v9  ;;  %v1346_v27 = vmul.f32 0.044715, %v3934_v53 }
 0x1ab   : > { %v1559_v61 = vmul.f32 %v1527_v40, %v1231_v39  ;;  %v1530_v39 = vmul.f32 %v1498_v3, %v1274_v49  ;;  %v1405_v40 = vadd.f32 1.0, %v1373_v47  ;;  %v1499_v29 = vadd.f32 1.0, %v3061_v30  ;;  %v3063_v2 = vpop.eup %3062 }
 0x1ac   : > { %v1560_v19 = vmul.f32 %v1528_v8, %v1136_v11  ;;  %3064 = vtanh.f32 %v1438_v58  ;;  %v1376_v3 = vmul.f32 %v1344_v57, %v3922_v36  ;;  %v1439_v1 = vmul.f32 %v1407_v54, %v1311_v15 }
 0x1ad   : > { %v1589_v0 = vpack.c.bf16 %v1559_v61, %v1557_v31  ;;  %v1437_v10 = vmul.f32 %v1405_v40, %v1309_v38  ;;  %v1378_v9 = vmul.f32 %v1346_v27, %v3934_v53  ;;  %v1529_v11 = vmul.f32 %v1497_v35, %v1273_v60 }
 0x1ae   : > { %v1408_v58 = vadd.f32 1.0, %v1376_v3  ;;  %v1347_v30 = vmul.f32 0.044715, %v3938_v62  ;;  %v1500_v40 = vadd.f32 1.0, %v3063_v2  ;;  %v1314_v54 = vmul.f32 0.7978846, %v3934_v53 }
 0x1af   : > { %1885 = vmatmul.bf16.vlgmr.msra.gmra.mxu1 %v1589_v0  ;;  %1983 = vmatmul.bf16.vlgmr.msra.gmra.mxu3 %v1589_v0  ;;  %v1184_v45 = vpop.f32.mrf.mxu2  ;;  %v1275_v0 = vmul.f32 0.5, %v3898_v63  ;;  %3066 = vtanh.f32 %v1437_v10  ;;  %v1410_v8 = vadd.f32 1.0, %v1378_v9  ;;  %v1276_v57 = vmul.f32 0.5, %v3902_v4 }
 0x1b0   : > { %v1233_v17 = vpop.f32.mrf.mxu3  ;;  %v1088_v34 = vpop.f32.mrf.mxu0  ;;  %3068 = vtanh.f32 %v1439_v1  ;;  %v1278_v15 = vmul.f32 0.5, %v3914_v33  ;;  %v4088_v60 = vadd.f32 %v3954_v20, %v3948_v12  ;;  %v1313_v2 = vmul.f32 0.7978846, %v3930_v44 }
 0x1b1   : > { %v1137_v25 = vpop.f32.mrf.mxu1  ;;  %v1234_v61 = vadd.f32 %v1233_v17, %v1184_v45  ;;  %v1532_v3 = vmul.f32 %v1500_v40, %v1276_v57  ;;  %v1315_v20 = vmul.f32 0.7978846, %v3938_v62 }
 0x1b2   : > { %v1138_v32 = vadd.f32 %v1137_v25, %v1088_v34  ;;  %v1531_v34 = vmul.f32 %v1499_v29, %v1275_v0  ;;  %v3065_v17 = vpop.eup %3064  ;;  %v1312_v25 = vmul.f32 0.7978846, %v3922_v36  ;;  %v1442_v0 = vmul.f32 %v1410_v8, %v1314_v54 }
 0x1b3   : > { %v1561_v49 = vmul.f32 %v1529_v11, %v1234_v61  ;;  %v1502_v35 = vadd.f32 1.0, %v3065_v17 }
 0x1b4   : > { %v1562_v43 = vmul.f32 %v1530_v39, %v1138_v32  ;;  %v1377_v39 = vmul.f32 %v1345_v46, %v3930_v44 }
 0x1b5   : > { %v3067_v61 = vpop.eup %3066  ;;  %v1534_v1 = vmul.f32 %v1502_v35, %v1278_v15 }
 0x1b6   : > { %v1590_v31 = vpack.c.bf16 %v1562_v43, %v1560_v19  ;;  %v1379_v43 = vmul.f32 %v1347_v30, %v3938_v62  ;;  %v3069_v10 = vpop.eup %3068  ;;  %v1409_v4 = vadd.f32 1.0, %v1377_v39  ;;  %v4099_v30 = vadd.f32 %v3960_v23, %v3958_v22 }
 0x1b7   : > { %v1186_v59 = vpop.f32.mrf.mxu2  ;;  %v1503_v12 = vadd.f32 1.0, %v3069_v10  ;;  %v1349_v22 = vmul.f32 0.044715, %v3952_v18  ;;  %v1318_v10 = vmul.f32 0.7978846, %v4088_v60 }
 0x1b8   : > { %v1235_v47 = vpop.f32.mrf.mxu3  ;;  %1841 = vmatmul.bf16.gmra.mxu0 %v1590_v31  ;;  %1939 = vmatmul.bf16.gmra.mxu2 %v1590_v31  ;;  %v1091_v28 = vpop.f32.mrf.mxu0  ;;  %v1440_v31 = vmul.f32 %v1408_v58, %v1312_v25  ;;  %v1411_v9 = vadd.f32 1.0, %v1379_v43  ;;  %v1441_v46 = vmul.f32 %v1409_v4, %v1313_v2  ;;  %v1279_v58 = vmul.f32 0.5, %v3918_v26 }
 0x1b9   : > { %v1236_v13 = vadd.f32 %v1235_v47, %v1186_v59  ;;  %v1140_v45 = vpop.f32.mrf.mxu1 }
 0x1ba   : > { %v1141_v38 = vadd.f32 %v1140_v45, %v1091_v28  ;;  %v1348_v28 = vmul.f32 0.044715, %v3942_v5  ;;  %3070 = vtanh.f32 %v1440_v31  ;;  %v1443_v39 = vmul.f32 %v1411_v9, %v1315_v20 }
 0x1bb   : > { %v1563_v63 = vmul.f32 %v1531_v34, %v1236_v13  ;;  %v1350_v13 = vmul.f32 0.044715, %v4088_v60  ;;  %v1501_v34 = vadd.f32 1.0, %v3067_v61  ;;  %3072 = vtanh.f32 %v1442_v0 }
 0x1bc   : > { %v1564_v11 = vmul.f32 %v1532_v3, %v1141_v38  ;;  %v1380_v17 = vmul.f32 %v1348_v28, %v3942_v5  ;;  %v1535_v57 = vmul.f32 %v1503_v12, %v1279_v58  ;;  %3074 = vtanh.f32 %v1441_v46 }
 0x1bd   : > { %v1591_v32 = vpack.c.bf16 %v1563_v63, %v1561_v49  ;;  %v1277_v63 = vmul.f32 0.5, %v3910_v14  ;;  %v1382_v40 = vmul.f32 %v1350_v13, %v4088_v60  ;;  %v1316_v14 = vmul.f32 0.7978846, %v3942_v5 }
 0x1be   : > { %v1412_v38 = vadd.f32 1.0, %v1380_v17  ;;  %3076 = vtanh.f32 %v1443_v39  ;;  %v1381_v0 = vmul.f32 %v1349_v22, %v3952_v18  ;;  %v1280_v28 = vmul.f32 0.5, %v3922_v36 }
 0x1bf   : > { %1890 = vmatmul.bf16.gmra.mxu1 %v1591_v32  ;;  %1988 = vmatmul.bf16.gmra.mxu3 %v1591_v32  ;;  %v1189_v19 = vpop.f32.mrf.mxu2  ;;  %v1533_v35 = vmul.f32 %v1501_v34, %v1277_v63  ;;  %v1414_v15 = vadd.f32 1.0, %v1382_v40  ;;  %v4112_v13 = vadd.f32 %v3978_v52, %v3972_v42  ;;  %v1352_v36 = vmul.f32 0.044715, %v3966_v37 }
 0x1c0   : > { %v1238_v27 = vpop.f32.mrf.mxu3  ;;  %v1093_v29 = vpop.f32.mrf.mxu0  ;;  %v1444_v3 = vmul.f32 %v1412_v38, %v1316_v14  ;;  %v1319_v52 = vmul.f32 0.7978846, %v4099_v30  ;;  %v4123_v14 = vadd.f32 %v3984_v56, %v3982_v16  ;;  %v1320_v16 = vmul.f32 0.7978846, %v3966_v37 }
 0x1c1   : > { %v1142_v59 = vpop.f32.mrf.mxu1  ;;  %v1239_v49 = vadd.f32 %v1238_v27, %v1189_v19  ;;  %v3071_v43 = vpop.eup %3070  ;;  %v1446_v12 = vmul.f32 %v1414_v15, %v1318_v10 }
 0x1c2   : > { %v1143_v47 = vadd.f32 %v1142_v59, %v1093_v29  ;;  %v3073_v26 = vpop.eup %3072  ;;  %v1351_v29 = vmul.f32 0.044715, %v4099_v30  ;;  %v1504_v61 = vadd.f32 1.0, %v3071_v43  ;;  %3078 = vtanh.f32 %v1444_v3 }
 0x1c3   : > { %v1565_v23 = vmul.f32 %v1533_v35, %v1239_v49  ;;  %v1506_v59 = vadd.f32 1.0, %v3073_v26  ;;  %v1413_v49 = vadd.f32 1.0, %v1381_v0  ;;  %3080 = vtanh.f32 %v1446_v12 }
 0x1c4   : > { %v1566_v33 = vmul.f32 %v1534_v1, %v1143_v47  ;;  %v3075_v47 = vpop.eup %3074  ;;  %v1383_v1 = vmul.f32 %v1351_v29, %v4099_v30  ;;  %v1281_v35 = vmul.f32 0.5, %v3930_v44  ;;  %v1384_v43 = vmul.f32 %v1352_v36, %v3966_v37 }
 0x1c5   : > { %v3077_v20 = vpop.eup %3076  ;;  %v1505_v63 = vadd.f32 1.0, %v3075_v47  ;;  %v1355_v10 = vmul.f32 0.044715, %v4123_v14 }
 0x1c6   : > { %v1592_v45 = vpack.c.bf16 %v1566_v33, %v1564_v11  ;;  %v1282_v33 = vmul.f32 0.5, %v3934_v53  ;;  %v1317_v53 = vmul.f32 0.7978846, %v3952_v18  ;;  %v1507_v42 = vadd.f32 1.0, %v3077_v20 }
 0x1c7   : > { %v1191_v25 = vpop.f32.mrf.mxu2  ;;  %v1537_v29 = vmul.f32 %v1505_v63, %v1281_v35  ;;  %v1416_v56 = vadd.f32 1.0, %v1384_v43 }
 0x1c8   : > { %v1240_v8 = vpop.f32.mrf.mxu3  ;;  %1846 = vmatmul.bf16.gmra.mxu0 %v1592_v45  ;;  %1944 = vmatmul.bf16.gmra.mxu2 %v1592_v45  ;;  %v1096_v32 = vpop.f32.mrf.mxu0  ;;  %v1536_v45 = vmul.f32 %v1504_v61, %v1280_v28  ;;  %v1538_v17 = vmul.f32 %v1506_v59, %v1282_v33  ;;  %v1322_v28 = vmul.f32 0.7978846, %v4112_v13  ;;  %v1387_v33 = vmul.f32 %v1355_v10, %v4123_v14 }
 0x1c9   : > { %v1241_v54 = vadd.f32 %v1240_v8, %v1191_v25  ;;  %v1145_v19 = vpop.f32.mrf.mxu1  ;;  %v1415_v25 = vadd.f32 1.0, %v1383_v1 }
 0x1ca   : > { %v1146_v2 = vadd.f32 %v1145_v19, %v1096_v32  ;;  %v1354_v32 = vmul.f32 0.044715, %v4112_v13  ;;  %v1445_v19 = vmul.f32 %v1413_v49, %v1317_v53  ;;  %v4136_v49 = vadd.f32 %v4004_v48, %v3998_v7 }
 0x1cb   : > { %v1567_v27 = vmul.f32 %v1535_v57, %v1241_v54  ;;  %v1283_v57 = vmul.f32 0.5, %v3938_v62  ;;  %v1447_v22 = vmul.f32 %v1415_v25, %v1319_v52  ;;  %v1353_v62 = vmul.f32 0.044715, %v3976_v51 }
 0x1cc   : > { %v1568_v58 = vmul.f32 %v1536_v45, %v1146_v2  ;;  %3082 = vtanh.f32 %v1445_v19  ;;  %v1286_v45 = vmul.f32 0.5, %v4088_v60  ;;  %v1419_v52 = vadd.f32 1.0, %v1387_v33 }
 0x1cd   : > { %v1593_v31 = vpack.c.bf16 %v1567_v27, %v1565_v23  ;;  %v3079_v23 = vpop.eup %3078  ;;  %v1386_v27 = vmul.f32 %v1354_v32, %v4112_v13  ;;  %v1539_v15 = vmul.f32 %v1507_v42, %v1283_v57  ;;  %3084 = vtanh.f32 %v1447_v22 }
 0x1ce   : > { %v3081_v61 = vpop.eup %3080  ;;  %v1385_v47 = vmul.f32 %v1353_v62, %v3976_v51  ;;  %v1508_v1 = vadd.f32 1.0, %v3079_v23  ;;  %v1321_v32 = vmul.f32 0.7978846, %v3976_v51  ;;  %v1356_v42 = vmul.f32 0.044715, %v3990_v6 }
 0x1cf   : > { %1895 = vmatmul.bf16.gmra.mxu1 %v1593_v31  ;;  %1993 = vmatmul.bf16.gmra.mxu3 %v1593_v31  ;;  %v1194_v4 = vpop.f32.mrf.mxu2  ;;  %v1510_v2 = vadd.f32 1.0, %v3081_v61  ;;  %v1323_v48 = vmul.f32 0.7978846, %v4123_v14  ;;  %v1287_v22 = vmul.f32 0.5, %v4099_v30  ;;  %v4147_v23 = vadd.f32 %v4015_v55, %v4012_v41 }
 0x1d0   : > { %v1243_v9 = vpop.f32.mrf.mxu3  ;;  %v1098_v11 = vpop.f32.mrf.mxu0  ;;  %v1388_v19 = vmul.f32 %v1356_v42, %v3990_v6  ;;  %v1357_v41 = vmul.f32 0.044715, %v4002_v24 }
 0x1d1   : > { %v1147_v34 = vpop.f32.mrf.mxu1  ;;  %v1244_v40 = vadd.f32 %v1243_v9, %v1194_v4  ;;  %v1418_v4 = vadd.f32 1.0, %v1386_v27  ;;  %v1284_v9 = vmul.f32 0.5, %v3942_v5  ;;  %v1417_v5 = vadd.f32 1.0, %v1385_v47 }
 0x1d2   : > { %v1148_v46 = vadd.f32 %v1147_v34, %v1098_v11  ;;  %v1542_v53 = vmul.f32 %v1510_v2, %v1286_v45  ;;  %v1359_v10 = vmul.f32 0.044715, %v4147_v23  ;;  %v1389_v2 = vmul.f32 %v1357_v41, %v4002_v24 }
 0x1d3   : > { %v1569_v59 = vmul.f32 %v1537_v29, %v1244_v40  ;;  %v1450_v25 = vmul.f32 %v1418_v4, %v1322_v28  ;;  %v1358_v40 = vmul.f32 0.044715, %v4136_v49  ;;  %v1449_v57 = vmul.f32 %v1417_v5, %v1321_v32 }
 0x1d4   : > { %v1570_v8 = vmul.f32 %v1538_v17, %v1148_v46  ;;  %v1448_v46 = vmul.f32 %v1416_v56, %v1320_v16  ;;  %v3083_v17 = vpop.eup %3082  ;;  %v1420_v16 = vadd.f32 1.0, %v1388_v19  ;;  %v1326_v28 = vmul.f32 0.7978846, %v4136_v49 }
 0x1d5   : > { %v3085_v36 = vpop.eup %3084  ;;  %v1509_v35 = vadd.f32 1.0, %v3083_v17  ;;  %v1290_v17 = vmul.f32 0.5, %v4112_v13  ;;  %v1421_v32 = vadd.f32 1.0, %v1389_v2  ;;  %v1325_v13 = vmul.f32 0.7978846, %v4002_v24 }
 0x1d6   : > { %v1594_v39 = vpack.c.bf16 %v1570_v8, %v1568_v58  ;;  %v1540_v58 = vmul.f32 %v1508_v1, %v1284_v9  ;;  %3086 = vtanh.f32 %v1448_v46  ;;  %v1511_v7 = vadd.f32 1.0, %v3085_v36 }
 0x1d7   : > { %v1196_v54 = vpop.f32.mrf.mxu2  ;;  %3088 = vtanh.f32 %v1450_v25  ;;  %v1291_v19 = vmul.f32 0.5, %v4123_v14 }
 0x1d8   : > { %v1245_v26 = vpop.f32.mrf.mxu3  ;;  %1851 = vmatmul.bf16.gmra.mxu0 %v1594_v39  ;;  %1949 = vmatmul.bf16.gmra.mxu2 %v1594_v39  ;;  %v1101_v38 = vpop.f32.mrf.mxu0  ;;  %v1543_v61 = vmul.f32 %v1511_v7, %v1287_v22  ;;  %3090 = vtanh.f32 %v1449_v57  ;;  %v4318_v22 = vld [vmem:[#allocation29_spill] sm:$0xff] }
 0x1d9   : > { %v1246_v44 = vadd.f32 %v1245_v26, %v1196_v54  ;;  %v1150_v31 = vpop.f32.mrf.mxu1  ;;  %v1285_v26 = vmul.f32 0.5, %v3952_v18  ;;  %v1324_v18 = vmul.f32 0.7978846, %v3990_v6 }
 0x1da   : > { %v1151_v34 = vadd.f32 %v1150_v31, %v1101_v38 }
 0x1db   : > { %v1571_v0 = vmul.f32 %v1539_v15, %v1246_v44  ;;  %v1451_v44 = vmul.f32 %v1419_v52, %v1323_v48  ;;  %v1390_v15 = vmul.f32 %v1358_v40, %v4136_v49  ;;  %v1541_v31 = vmul.f32 %v1509_v35, %v1285_v26 }
 0x1dc   : > { %v1572_v39 = vmul.f32 %v1540_v58, %v1151_v34  ;;  %v1391_v34 = vmul.f32 %v1359_v10, %v4147_v23 }
 0x1dd   : > { %v1595_v3 = vpack.c.bf16 %v1571_v0, %v1569_v59  ;;  %v3087_v0 = vpop.eup %3086  ;;  %3092 = vtanh.f32 %v1451_v44  ;;  %v1422_v4 = vadd.f32 1.0, %v1390_v15 }
 0x1de   : > { %v3089_v30 = vpop.eup %3088  ;;  %v1512_v47 = vadd.f32 1.0, %v3087_v0  ;;  %v1423_v52 = vadd.f32 1.0, %v1391_v34 }
 0x1df   : > { %1900 = vmatmul.bf16.gmra.mxu1 %v1595_v3  ;;  %1998 = vmatmul.bf16.gmra.mxu3 %v1595_v3  ;;  %v1199_v11 = vpop.f32.mrf.mxu2  ;;  %v1514_v1 = vadd.f32 1.0, %v3089_v30  ;;  %v3091_v33 = vpop.eup %3090  ;;  %v1454_v36 = vmul.f32 %v1422_v4, %v1326_v28 }
 0x1e0   : > { %v1248_v12 = vpop.f32.mrf.mxu3  ;;  %v1103_v20 = vpop.f32.mrf.mxu0  ;;  %v1513_v42 = vadd.f32 1.0, %v3091_v33 }
 0x1e1   : > { %v1152_v63 = vpop.f32.mrf.mxu1  ;;  %v1249_v43 = vadd.f32 %v1248_v12, %v1199_v11  ;;  %v1452_v11 = vmul.f32 %v1420_v16, %v1324_v18  ;;  %v4319_v18 = vld [vmem:[#allocation27_spill] sm:$0xff] }
 0x1e2   : > { %v1153_v8 = vadd.f32 %v1152_v63, %v1103_v20  ;;  %v1288_v20 = vmul.f32 0.5, %v3966_v37  ;;  %v4160_v63 = vadd.f32 %v4034_v50, %v4030_v21  ;;  %v1327_v50 = vmul.f32 0.7978846, %v4147_v23 }
 0x1e3   : > { %v1573_v55 = vmul.f32 %v1541_v31, %v1249_v43  ;;  %v3093_v5 = vpop.eup %3092  ;;  %3094 = vtanh.f32 %v1452_v11  ;;  %v1453_v43 = vmul.f32 %v1421_v32, %v1325_v13  ;;  %v1361_v30 = vmul.f32 0.044715, %v4319_v18 }
 0x1e4   : > { %v1574_v60 = vmul.f32 %v1542_v53, %v1153_v8  ;;  %v1544_v58 = vmul.f32 %v1512_v47, %v1288_v20  ;;  %v1546_v53 = vmul.f32 %v1514_v1, %v1290_v17  ;;  %v1362_v35 = vmul.f32 0.044715, %v4160_v63 }
 0x1e5   : > { %v1515_v21 = vadd.f32 1.0, %v3093_v5  ;;  %3096 = vtanh.f32 %v1454_v36  ;;  %v1455_v15 = vmul.f32 %v1423_v52, %v1327_v50  ;;  %v1393_v2 = vmul.f32 %v1361_v30, %v4319_v18 }
 0x1e6   : > { %v1596_v54 = vpack.c.bf16 %v1574_v60, %v1572_v39  ;;  %v4316_v39 = vld [vmem:[#allocation26_spill] sm:$0xff]  ;;  %3098 = vtanh.f32 %v1453_v43  ;;  %v1330_v28 = vmul.f32 0.7978846, %v4160_v63  ;;  %v1298_v30 = vmul.f32 0.5, %v4160_v63 }
 0x1e7   : > { %v1201_v38 = vpop.f32.mrf.mxu2  ;;  %v1360_v37 = vmul.f32 0.044715, %v4316_v39  ;;  %3100 = vtanh.f32 %v1455_v15  ;;  %v1425_v32 = vadd.f32 1.0, %v1393_v2 }
 0x1e8   : > { %v1250_v27 = vpop.f32.mrf.mxu3  ;;  %1856 = vmatmul.bf16.gmra.mxu0 %v1596_v54  ;;  %1954 = vmatmul.bf16.gmra.mxu2 %v1596_v54  ;;  %v1106_v29 = vpop.f32.mrf.mxu0  ;;  %v1289_v54 = vmul.f32 0.5, %v3976_v51 }
 0x1e9   : > { %v1251_v62 = vadd.f32 %v1250_v27, %v1201_v38  ;;  %v1155_v59 = vpop.f32.mrf.mxu1  ;;  %v1392_v26 = vmul.f32 %v1360_v37, %v4316_v39  ;;  %v4317_v38 = vld [vmem:[#allocation28_spill] sm:$0xff]  ;;  %v3095_v31 = vpop.eup %3094  ;;  %v1329_v37 = vmul.f32 0.7978846, %v4319_v18 }
 0x1ea   : > { %v1156_v12 = vadd.f32 %v1155_v59, %v1106_v29  ;;  %v4171_v27 = vadd.f32 %v4318_v22, %v4317_v38  ;;  %v1547_v59 = vmul.f32 %v1515_v21, %v1291_v19  ;;  %v1516_v47 = vadd.f32 1.0, %v3095_v31 }
 0x1eb   : > { %v1575_v56 = vmul.f32 %v1543_v61, %v1251_v62  ;;  %v1394_v62 = vmul.f32 %v1362_v35, %v4160_v63  ;;  %v1545_v61 = vmul.f32 %v1513_v42, %v1289_v54  ;;  %v3097_v14 = vpop.eup %3096  ;;  %v1293_v21 = vmul.f32 0.5, %v4002_v24 }
 0x1ec   : > { %v1576_v60 = vmul.f32 %v1544_v58, %v1156_v12  ;;  %v1363_v10 = vmul.f32 0.044715, %v4171_v27  ;;  %v1518_v1 = vadd.f32 1.0, %v3097_v14  ;;  %v3099_v17 = vpop.eup %3098 }
 0x1ed   : > { %v1597_v3 = vpack.c.bf16 %v1575_v56, %v1573_v55  ;;  %v1328_v55 = vmul.f32 0.7978846, %v4316_v39  ;;  %v1424_v56 = vadd.f32 1.0, %v1392_v26  ;;  %v1426_v4 = vadd.f32 1.0, %v1394_v62  ;;  %v3101_v5 = vpop.eup %3100 }
 0x1ee   : > { %v1395_v33 = vmul.f32 %v1363_v10, %v4171_v27 }
 0x1ef   : > { %1905 = vmatmul.bf16.gmra.mxu1 %v1597_v3  ;;  %2003 = vmatmul.bf16.gmra.mxu3 %v1597_v3  ;;  %v1204_v9 = vpop.f32.mrf.mxu2  ;;  %v1458_v36 = vmul.f32 %v1426_v4, %v1330_v28 }
 0x1f0   : > { %v1253_v45 = vpop.f32.mrf.mxu3  ;;  %v1108_v46 = vpop.f32.mrf.mxu0 }
 0x1f1   : > { %v1157_v25 = vpop.f32.mrf.mxu1  ;;  %v1254_v48 = vadd.f32 %v1253_v45, %v1204_v9  ;;  %v1292_v9 = vmul.f32 0.5, %v3990_v6  ;;  %v1294_v45 = vmul.f32 0.5, %v4136_v49  ;;  %v1427_v6 = vadd.f32 1.0, %v1395_v33 }
 0x1f2   : > { %v1158_v8 = vadd.f32 %v1157_v25, %v1108_v46  ;;  %v1456_v46 = vmul.f32 %v1424_v56, %v1328_v55  ;;  %v1331_v49 = vmul.f32 0.7978846, %v4171_v27 }
 0x1f3   : > { %v1577_v16 = vmul.f32 %v1545_v61, %v1254_v48  ;;  %v1548_v58 = vmul.f32 %v1516_v47, %v1292_v9  ;;  %v1457_v48 = vmul.f32 %v1425_v32, %v1329_v37 }
 0x1f4   : > { %v1578_v40 = vmul.f32 %v1546_v53, %v1158_v8  ;;  %v1550_v53 = vmul.f32 %v1518_v1, %v1294_v45  ;;  %3102 = vtanh.f32 %v1456_v46  ;;  %v1459_v19 = vmul.f32 %v1427_v6, %v1331_v49 }
 0x1f5   : > { %3104 = vtanh.f32 %v1458_v36 }
 0x1f6   : > { %v1598_v7 = vpack.c.bf16 %v1578_v40, %v1576_v60  ;;  %v1517_v60 = vadd.f32 1.0, %v3099_v17  ;;  %v1519_v40 = vadd.f32 1.0, %v3101_v5  ;;  %3106 = vtanh.f32 %v1457_v48  ;;  %v1604_v5 = vld [vmem:[#allocation2 + $0xb0] sm:$0xff] }
 0x1f7   : > { %v1206_v57 = vpop.f32.mrf.mxu2  ;;  %3108 = vtanh.f32 %v1459_v19  ;;  %v1608_v48 = vld [vmem:[#allocation2 + $0x50] sm:$0xff] }
 0x1f8   : > { %v1255_v29 = vpop.f32.mrf.mxu3  ;;  %1861 = vmatmul.bf16.gmra.mxu0 %v1598_v7  ;;  %1959 = vmatmul.bf16.gmra.mxu2 %v1598_v7  ;;  %v1111_v44 = vpop.f32.mrf.mxu0  ;;  %v1295_v7 = vmul.f32 0.5, %v4147_v23  ;;  %v1549_v43 = vmul.f32 %v1517_v60, %v1293_v21 }
 0x1f9   : > { %v1256_v51 = vadd.f32 %v1255_v29, %v1206_v57  ;;  %v1160_v0 = vpop.f32.mrf.mxu1 }
 0x1fa   : > { %v1161_v34 = vadd.f32 %v1160_v0, %v1111_v44  ;;  %v1551_v38 = vmul.f32 %v1519_v40, %v1295_v7  ;;  %v3103_v29 = vpop.eup %3102 }
 0x1fb   : > { %v1579_v41 = vmul.f32 %v1547_v59, %v1256_v51  ;;  %v3105_v44 = vpop.eup %3104  ;;  %v1520_v62 = vadd.f32 1.0, %v3103_v29  ;;  %v1296_v59 = vmul.f32 0.5, %v4316_v39  ;;  %v1299_v39 = vmul.f32 0.5, %v4171_v27  ;;  %v1605_v27 = vld [vmem:[#allocation2] sm:$0xff] }
 0x1fc   : > { %v1580_v42 = vmul.f32 %v1548_v58, %v1161_v34  ;;  %v1522_v61 = vadd.f32 1.0, %v3105_v44 }
 0x1fd   : > { %v1599_v3 = vpack.c.bf16 %v1579_v41, %v1577_v16  ;;  %v3107_v16 = vpop.eup %3106  ;;  %v1552_v56 = vmul.f32 %v1520_v62, %v1296_v59 }
 0x1fe   : > { %v3109_v55 = vpop.eup %3108  ;;  %v1554_v4 = vmul.f32 %v1522_v61, %v1298_v30  ;;  %v1521_v1 = vadd.f32 1.0, %v3107_v16  ;;  %v1612_v30 = vld [vmem:[#allocation2 + $0x80] sm:$0xff] }
 0x1ff   : > { %1910 = vmatmul.bf16.gmra.mxu1 %v1599_v3  ;;  %2008 = vmatmul.bf16.gmra.mxu3 %v1599_v3  ;;  %v1209_v11 = vpop.f32.mrf.mxu2  ;;  %v1523_v2 = vadd.f32 1.0, %v3109_v55 }
 0x200   : > { %v1258_v12 = vpop.f32.mrf.mxu3  ;;  %v1113_v20 = vpop.f32.mrf.mxu0 }
 0x201   : > { %v1162_v25 = vpop.f32.mrf.mxu1  ;;  %v1259_v35 = vadd.f32 %v1258_v12, %v1209_v11  ;;  %v1297_v11 = vmul.f32 0.5, %v4319_v18 }
 0x202   : > { %v1163_v8 = vadd.f32 %v1162_v25, %v1113_v20  ;;  %v1555_v20 = vmul.f32 %v1523_v2, %v1299_v39  ;;  %v1614_v2 = vld [vmem:[#allocation2 + $0xe8] sm:$0xff] }
 0x203   : > { %v1581_v15 = vmul.f32 %v1549_v43, %v1259_v35  ;;  %v1553_v63 = vmul.f32 %v1521_v1, %v1297_v11  ;;  %v1607_v35 = vld [vmem:[#allocation2 + $0x18] sm:$0xff] }
 0x204   : > { %v1582_v52 = vmul.f32 %v1550_v53, %v1163_v8 }
 0x206   : > { %v1600_v13 = vpack.c.bf16 %v1582_v52, %v1580_v42  ;;  %v1606_v52 = vld [vmem:[#allocation2 + $0xd8] sm:$0xff] }
 0x207   : > { %v1211_v50 = vpop.f32.mrf.mxu2 }
 0x208   : > { %v1260_v54 = vpop.f32.mrf.mxu3  ;;  %1866 = vmatmul.bf16.gmra.mxu0 %v1600_v13  ;;  %1964 = vmatmul.bf16.gmra.mxu2 %v1600_v13  ;;  %v1116_v57 = vpop.f32.mrf.mxu0 }
 0x209   : > { %v1261_v26 = vadd.f32 %v1260_v54, %v1211_v50  ;;  %v1165_v22 = vpop.f32.mrf.mxu1 }
 0x20a   : > { %v1166_v51 = vadd.f32 %v1165_v22, %v1116_v57 }
 0x20b   : > { %v1583_v31 = vmul.f32 %v1551_v38, %v1261_v26  ;;  %v1609_v38 = vld [vmem:[#allocation2 + $0x68] sm:$0xff] }
 0x20c   : > { %v1584_v3 = vmul.f32 %v1552_v56, %v1166_v51  ;;  %v1611_v51 = vld [vmem:[#allocation2 + $0x48] sm:$0xff] }
 0x20d   : > { %v1601_v24 = vpack.c.bf16 %v1583_v31, %v1581_v15  ;;  %v1610_v15 = vld [vmem:[#allocation2 + $0x30] sm:$0xff] }
 0x20f   : > { %1915 = vmatmul.bf16.gmra.mxu1 %v1601_v24  ;;  %2013 = vmatmul.bf16.gmra.mxu3 %v1601_v24  ;;  %v1214_v23 = vpop.f32.mrf.mxu2 }
 0x210   : > { %v1263_v0 = vpop.f32.mrf.mxu3  ;;  %v1118_v14 = vpop.f32.mrf.mxu0 }
 0x211   : > { %v1167_v41 = vpop.f32.mrf.mxu1  ;;  %v1264_v9 = vadd.f32 %v1263_v0, %v1214_v23 }
 0x212   : > { %v1168_v10 = vadd.f32 %v1167_v41, %v1118_v14 }
 0x213   : > { %v1585_v45 = vmul.f32 %v1553_v63, %v1264_v9 }
 0x214   : > { %v1586_v47 = vmul.f32 %v1554_v4, %v1168_v10  ;;  %v1613_v4 = vld [vmem:[#allocation2 + $0x88] sm:$0xff] }
 0x216   : > { %v1602_v28 = vpack.c.bf16 %v1586_v47, %v1584_v3 }
 0x217   : > { %v1216_v33 = vpop.f32.mrf.mxu2 }
 0x218   : > { %v1265_v34 = vpop.f32.mrf.mxu3  ;;  %1871 = vmatmul.bf16.gmra.mxu0 %v1602_v28  ;;  %1969 = vmatmul.bf16.gmra.mxu2 %v1602_v28 }
 0x219   : > { %v1266_v12 = vadd.f32 %v1265_v34, %v1216_v33  ;;  %v1615_v34 = vld [vmem:[#allocation2 + $0xb8] sm:$0xff] }
 0x21b   : > { %v1587_v46 = vmul.f32 %v1555_v20, %v1266_v12 }
 0x21d   : > { %v1603_v17 = vpack.c.bf16 %v1587_v46, %v1585_v45  ;;  %v1616_v45 = vld [vmem:[#allocation2 + $0x60] sm:$0xff] }
 0x21f   : > { %1920 = vmatmul.bf16.gmra.mxu1 %v1603_v17  ;;  %2018 = vmatmul.bf16.gmra.mxu3 %v1603_v17 }
 0x225   : > { %v1837_v25 = vpop.f32.mrf.mxu0 }
 0x22b   : > { %v1935_v36 = vpop.f32.mrf.mxu2 }
 0x22c   : > { %v1886_v58 = vpop.f32.mrf.mxu1 }
 0x22d   : > { %v1887_v8 = vadd.f32 %v1886_v58, %v1837_v25  ;;  %v1839_v18 = vpop.f32.mrf.mxu0  ;;  %v1617_v58 = vld [vmem:[#allocation2 + $0xf0] sm:$0xff] }
 0x22f   : > { %v2024_v53 = vadd.f32 %v1887_v8, %v1604_v5 }
 0x231   : > { %2056 = vst [vmem:[#allocation2 + $0xb0] sm:$0xff] %v2024_v53 }
 0x232   : > { %v1984_v32 = vpop.f32.mrf.mxu3 }
 0x233   : > { %v1985_v6 = vadd.f32 %v1984_v32, %v1935_v36  ;;  %v1937_v42 = vpop.f32.mrf.mxu2 }
 0x234   : > { %v1888_v37 = vpop.f32.mrf.mxu1 }
 0x235   : > { %v2025_v60 = vadd.f32 %v1985_v6, %v1605_v27  ;;  %v1889_v40 = vadd.f32 %v1888_v37, %v1839_v18  ;;  %v1842_v49 = vpop.f32.mrf.mxu0  ;;  %v1618_v27 = vld [vmem:[#allocation2 + $0x8] sm:$0xff] }
 0x237   : > { %2057 = vst [vmem:[#allocation2] sm:$0xff] %v2025_v60  ;;  %v2026_v13 = vadd.f32 %v1889_v40, %v1606_v52  ;;  %v1619_v60 = vld [vmem:[#allocation2 + $0x78] sm:$0xff] }
 0x239   : > { %2058 = vst [vmem:[#allocation2 + $0xd8] sm:$0xff] %v2026_v13 }
 0x23a   : > { %v1986_v21 = vpop.f32.mrf.mxu3 }
 0x23b   : > { %v1987_v50 = vadd.f32 %v1986_v21, %v1937_v42  ;;  %v1940_v7 = vpop.f32.mrf.mxu2 }
 0x23c   : > { %v1891_v54 = vpop.f32.mrf.mxu1 }
 0x23d   : > { %v2027_v57 = vadd.f32 %v1987_v50, %v1607_v35  ;;  %v1892_v19 = vadd.f32 %v1891_v54, %v1842_v49  ;;  %v1844_v43 = vpop.f32.mrf.mxu0  ;;  %v1620_v35 = vld [vmem:[#allocation2 + $0x38] sm:$0xff] }
 0x23f   : > { %2059 = vst [vmem:[#allocation2 + $0x18] sm:$0xff] %v2027_v57  ;;  %v2028_v26 = vadd.f32 %v1892_v19, %v1608_v48  ;;  %v1621_v57 = vld [vmem:[#allocation2 + $0x58] sm:$0xff] }
 0x241   : > { %2060 = vst [vmem:[#allocation2 + $0x50] sm:$0xff] %v2028_v26 }
 0x242   : > { %v1989_v22 = vpop.f32.mrf.mxu3 }
 0x243   : > { %v1990_v29 = vadd.f32 %v1989_v22, %v1940_v7  ;;  %v1942_v44 = vpop.f32.mrf.mxu2 }
 0x244   : > { %v1893_v31 = vpop.f32.mrf.mxu1 }
 0x245   : > { %v2029_v24 = vadd.f32 %v1990_v29, %v1609_v38  ;;  %v1894_v62 = vadd.f32 %v1893_v31, %v1844_v43  ;;  %v1847_v61 = vpop.f32.mrf.mxu0  ;;  %v1622_v38 = vld [vmem:[#allocation2 + $0x40] sm:$0xff] }
 0x247   : > { %2061 = vst [vmem:[#allocation2 + $0x68] sm:$0xff] %v2029_v24  ;;  %v2030_v23 = vadd.f32 %v1894_v62, %v1610_v15  ;;  %v1623_v24 = vld [vmem:[#allocation2 + $0xc8] sm:$0xff] }
 0x249   : > { %2062 = vst [vmem:[#allocation2 + $0x30] sm:$0xff] %v2030_v23 }
 0x24a   : > { %v1991_v59 = vpop.f32.mrf.mxu3 }
 0x24b   : > { %v1992_v0 = vadd.f32 %v1991_v59, %v1942_v44  ;;  %v1945_v14 = vpop.f32.mrf.mxu2 }
 0x24c   : > { %v1896_v16 = vpop.f32.mrf.mxu1 }
 0x24d   : > { %v2031_v41 = vadd.f32 %v1992_v0, %v1611_v51  ;;  %v1897_v55 = vadd.f32 %v1896_v16, %v1847_v61  ;;  %v1849_v56 = vpop.f32.mrf.mxu0  ;;  %v1624_v51 = vld [vmem:[#allocation2 + $0xe0] sm:$0xff] }
 0x24f   : > { %2063 = vst [vmem:[#allocation2 + $0x48] sm:$0xff] %v2031_v41  ;;  %v2032_v10 = vadd.f32 %v1897_v55, %v1612_v30  ;;  %v1625_v41 = vld [vmem:[#allocation2 + $0x90] sm:$0xff] }
 0x251   : > { %2064 = vst [vmem:[#allocation2 + $0x80] sm:$0xff] %v2032_v10 }
 0x252   : > { %v1994_v3 = vpop.f32.mrf.mxu3 }
 0x253   : > { %v1995_v47 = vadd.f32 %v1994_v3, %v1945_v14  ;;  %v1947_v1 = vpop.f32.mrf.mxu2 }
 0x254   : > { %v1898_v28 = vpop.f32.mrf.mxu1 }
 0x255   : > { %v2033_v9 = vadd.f32 %v1995_v47, %v1613_v4  ;;  %v1899_v11 = vadd.f32 %v1898_v28, %v1849_v56  ;;  %v1852_v33 = vpop.f32.mrf.mxu0  ;;  %v1626_v4 = vld [vmem:[#allocation2 + $0x70] sm:$0xff] }
 0x257   : > { %2065 = vst [vmem:[#allocation2 + $0x88] sm:$0xff] %v2033_v9  ;;  %v2034_v39 = vadd.f32 %v1899_v11, %v1614_v2  ;;  %v1627_v9 = vld [vmem:[#allocation2 + $0xc0] sm:$0xff] }
 0x259   : > { %2066 = vst [vmem:[#allocation2 + $0xe8] sm:$0xff] %v2034_v39  ;;  %v1628_v39 = vld [vmem:[#allocation2 + $0xa8] sm:$0xff] }
 0x25a   : > { %v1996_v63 = vpop.f32.mrf.mxu3 }
 0x25b   : > { %v1997_v12 = vadd.f32 %v1996_v63, %v1947_v1  ;;  %v1950_v20 = vpop.f32.mrf.mxu2 }
 0x25c   : > { %v1901_v46 = vpop.f32.mrf.mxu1 }
 0x25d   : > { %v2035_v17 = vadd.f32 %v1997_v12, %v1615_v34  ;;  %v1902_v25 = vadd.f32 %v1901_v46, %v1852_v33  ;;  %v1854_v36 = vpop.f32.mrf.mxu0 }
 0x25f   : > { %2067 = vst [vmem:[#allocation2 + $0xb8] sm:$0xff] %v2035_v17  ;;  %v2036_v5 = vadd.f32 %v1902_v25, %v1616_v45  ;;  %v1629_v17 = vld [vmem:[#allocation2 + $0xd0] sm:$0xff] }
 0x261   : > { %2068 = vst [vmem:[#allocation2 + $0x60] sm:$0xff] %v2036_v5  ;;  %v1630_v5 = vld [vmem:[#allocation2 + $0x10] sm:$0xff] }
 0x262   : > { %v1999_v8 = vpop.f32.mrf.mxu3 }
 0x263   : > { %v2000_v18 = vadd.f32 %v1999_v8, %v1950_v20  ;;  %v1952_v53 = vpop.f32.mrf.mxu2 }
 0x264   : > { %v1903_v32 = vpop.f32.mrf.mxu1 }
 0x265   : > { %v2037_v6 = vadd.f32 %v2000_v18, %v1617_v58  ;;  %v1904_v42 = vadd.f32 %v1903_v32, %v1854_v36  ;;  %v1857_v52 = vpop.f32.mrf.mxu0 }
 0x267   : > { %2069 = vst [vmem:[#allocation2 + $0xf0] sm:$0xff] %v2037_v6  ;;  %v2038_v37 = vadd.f32 %v1904_v42, %v1618_v27  ;;  %v1631_v6 = vld [vmem:[#allocation2 + $0x28] sm:$0xff] }
 0x269   : > { %2070 = vst [vmem:[#allocation2 + $0x8] sm:$0xff] %v2038_v37  ;;  %v1632_v37 = vld [vmem:[#allocation2 + $0xa0] sm:$0xff] }
 0x26a   : > { %v2001_v40 = vpop.f32.mrf.mxu3 }
 0x26b   : > { %v2002_v49 = vadd.f32 %v2001_v40, %v1952_v53  ;;  %v1955_v13 = vpop.f32.mrf.mxu2 }
 0x26c   : > { %v1906_v21 = vpop.f32.mrf.mxu1 }
 0x26d   : > { %v2039_v50 = vadd.f32 %v2002_v49, %v1619_v60  ;;  %v1907_v7 = vadd.f32 %v1906_v21, %v1857_v52  ;;  %v1859_v48 = vpop.f32.mrf.mxu0  ;;  %v1633_v21 = vld [vmem:[#allocation2 + $0xf8] sm:$0xff] }
 0x26f   : > { %2071 = vst [vmem:[#allocation2 + $0x78] sm:$0xff] %v2039_v50  ;;  %v2040_v54 = vadd.f32 %v1907_v7, %v1620_v35 }
 0x271   : > { %2072 = vst [vmem:[#allocation2 + $0x38] sm:$0xff] %v2040_v54  ;;  %v1634_v54 = vld [vmem:[#allocation2 + $0x20] sm:$0xff] }
 0x272   : > { %v2004_v19 = vpop.f32.mrf.mxu3 }
 0x273   : > { %v2005_v43 = vadd.f32 %v2004_v19, %v1955_v13  ;;  %v1957_v26 = vpop.f32.mrf.mxu2 }
 0x274   : > { %v1908_v22 = vpop.f32.mrf.mxu1 }
 0x275   : > { %v2041_v29 = vadd.f32 %v2005_v43, %v1621_v57  ;;  %v1909_v44 = vadd.f32 %v1908_v22, %v1859_v48  ;;  %v1862_v15 = vpop.f32.mrf.mxu0  ;;  %v1635_v22 = vld [vmem:[#allocation2 + $0x98] sm:$0xff] }
 0x277   : > { %2073 = vst [vmem:[#allocation2 + $0x58] sm:$0xff] %v2041_v29  ;;  %v2042_v31 = vadd.f32 %v1909_v44, %v1622_v38 }
 0x279   : > { %2074 = vst [vmem:[#allocation2 + $0x40] sm:$0xff] %v2042_v31 }
 0x27a   : > { %v2006_v62 = vpop.f32.mrf.mxu3 }
 0x27b   : > { %v2007_v61 = vadd.f32 %v2006_v62, %v1957_v26  ;;  %v1960_v23 = vpop.f32.mrf.mxu2 }
 0x27c   : > { %v1911_v59 = vpop.f32.mrf.mxu1 }
 0x27d   : > { %v2043_v0 = vadd.f32 %v2007_v61, %v1623_v24  ;;  %v1912_v14 = vadd.f32 %v1911_v59, %v1862_v15  ;;  %v1864_v30 = vpop.f32.mrf.mxu0 }
 0x27f   : > { %2075 = vst [vmem:[#allocation2 + $0xc8] sm:$0xff] %v2043_v0  ;;  %v2044_v16 = vadd.f32 %v1912_v14, %v1624_v51 }
 0x281   : > { %2076 = vst [vmem:[#allocation2 + $0xe0] sm:$0xff] %v2044_v16 }
 0x282   : > { %v2009_v55 = vpop.f32.mrf.mxu3 }
 0x283   : > { %v2010_v56 = vadd.f32 %v2009_v55, %v1960_v23  ;;  %v1962_v10 = vpop.f32.mrf.mxu2 }
 0x284   : > { %v1913_v3 = vpop.f32.mrf.mxu1 }
 0x285   : > { %v2045_v47 = vadd.f32 %v2010_v56, %v1625_v41  ;;  %v1914_v1 = vadd.f32 %v1913_v3, %v1864_v30  ;;  %v1867_v2 = vpop.f32.mrf.mxu0 }
 0x287   : > { %2077 = vst [vmem:[#allocation2 + $0x90] sm:$0xff] %v2045_v47  ;;  %v2046_v28 = vadd.f32 %v1914_v1, %v1626_v4 }
 0x289   : > { %2078 = vst [vmem:[#allocation2 + $0x70] sm:$0xff] %v2046_v28 }
 0x28a   : > { %v2011_v11 = vpop.f32.mrf.mxu3 }
 0x28b   : > { %v2012_v33 = vadd.f32 %v2011_v11, %v1962_v10  ;;  %v1965_v63 = vpop.f32.mrf.mxu2 }
 0x28c   : > { %v1916_v34 = vpop.f32.mrf.mxu1 }
 0x28d   : > { %v2047_v12 = vadd.f32 %v2012_v33, %v1627_v9  ;;  %v1917_v20 = vadd.f32 %v1916_v34, %v1867_v2  ;;  %v1869_v46 = vpop.f32.mrf.mxu0 }
 0x28f   : > { %2079 = vst [vmem:[#allocation2 + $0xc0] sm:$0xff] %v2047_v12  ;;  %v2048_v45 = vadd.f32 %v1917_v20, %v1628_v39 }
 0x291   : > { %2080 = vst [vmem:[#allocation2 + $0xa8] sm:$0xff] %v2048_v45 }
 0x292   : > { %v2014_v25 = vpop.f32.mrf.mxu3 }
 0x293   : > { %v2015_v36 = vadd.f32 %v2014_v25, %v1965_v63  ;;  %v1967_v53 = vpop.f32.mrf.mxu2 }
 0x294   : > { %v1918_v58 = vpop.f32.mrf.mxu1 }
 0x295   : > { %v2049_v8 = vadd.f32 %v2015_v36, %v1629_v17  ;;  %v1919_v18 = vadd.f32 %v1918_v58, %v1869_v46  ;;  %v1872_v32 = vpop.f32.mrf.mxu0 }
 0x297   : > { %2081 = vst [vmem:[#allocation2 + $0xd0] sm:$0xff] %v2049_v8  ;;  %v2050_v27 = vadd.f32 %v1919_v18, %v1630_v5 }
 0x299   : > { %2082 = vst [vmem:[#allocation2 + $0x10] sm:$0xff] %v2050_v27 }
 0x29a   : > { %v2016_v42 = vpop.f32.mrf.mxu3 }
 0x29b   : > { %v2017_v52 = vadd.f32 %v2016_v42, %v1967_v53  ;;  %v1970_v35 = vpop.f32.mrf.mxu2 }
 0x29c   : > { %v1921_v60 = vpop.f32.mrf.mxu1 }
 0x29d   : > { %v2051_v40 = vadd.f32 %v2017_v52, %v1631_v6  ;;  %v1922_v49 = vadd.f32 %v1921_v60, %v1872_v32  ;;  %v1874_v48 = vpop.f32.mrf.mxu0 }
 0x29f   : > { %2083 = vst [vmem:[#allocation2 + $0x28] sm:$0xff] %v2051_v40  ;;  %v2052_v13 = vadd.f32 %v1922_v49, %v1632_v37 }
 0x2a1   : > { %2084 = vst [vmem:[#allocation2 + $0xa0] sm:$0xff] %v2052_v13 }
 0x2a2   : > { %v2019_v50 = vpop.f32.mrf.mxu3 }
 0x2a3   : > { %v2020_v7 = vadd.f32 %v2019_v50, %v1970_v35  ;;  %v1972_v38 = vpop.f32.mrf.mxu2 }
 0x2a4   : > { %v1923_v57 = vpop.f32.mrf.mxu1 }
 0x2a5   : > { %v2053_v19 = vadd.f32 %v2020_v7, %v1633_v21  ;;  %v1924_v43 = vadd.f32 %v1923_v57, %v1874_v48 }
 0x2a7   : > { %2085 = vst [vmem:[#allocation2 + $0xf8] sm:$0xff] %v2053_v19  ;;  %v2054_v26 = vadd.f32 %v1924_v43, %v1634_v54 }
 0x2a9   : > { %2086 = vst [vmem:[#allocation2 + $0x20] sm:$0xff] %v2054_v26 }
 0x2aa   : > { %v2021_v29 = vpop.f32.mrf.mxu3 }
 0x2ab   : > { %v2022_v44 = vadd.f32 %v2021_v29, %v1972_v38  ;;  %2091 = sbr.rel (%p2796_p7) target bundleno = 707 (0x2c3), region = 60 }
 0x2ad   : > { %v2055_v15 = vadd.f32 %v2022_v44, %v1635_v22 }
 0x2af   : > { %2087 = vst [vmem:[#allocation2 + $0x98] sm:$0xff] %v2055_v15 }
 0x2b0   : > { %v2092_v31 = vld [vmem:[#allocation2 + $0xb0] sm:$0xff]  ;;  %v2093_v24 = vld [vmem:[#allocation2] sm:$0xff]  ;;  %v2094_v62 = vld [vmem:[#allocation2 + $0xd8] sm:$0xff] }
 0x2b1   : > { %v2124_v61 = vpack.c.bf16 %v2093_v24, %v2092_v31  ;;  %v2095_v23 = vld [vmem:[#allocation2 + $0x18] sm:$0xff]  ;;  %v2096_v51 = vld [vmem:[#allocation2 + $0x50] sm:$0xff]  ;;  %v2097_v59 = vld [vmem:[#allocation2 + $0x68] sm:$0xff] }
 0x2b2   : > { %v2125_v0 = vpack.c.bf16 %v2095_v23, %v2094_v62  ;;  %v2126_v14 = vpack.c.bf16 %v2097_v59, %v2096_v51  ;;  %v2098_v30 = vld [vmem:[#allocation2 + $0x30] sm:$0xff]  ;;  %v2099_v16 = vld [vmem:[#allocation2 + $0x48] sm:$0xff]  ;;  %v2100_v41 = vld [vmem:[#allocation2 + $0x80] sm:$0xff] }
 0x2b3   : > { %2140 = vst [vmem:[%s3627_s9] sm:$0xff] %v2124_v61  ;;  %v2127_v55 = vpack.c.bf16 %v2099_v16, %v2098_v30  ;;  %v2101_v56 = vld [vmem:[#allocation2 + $0x88] sm:$0xff]  ;;  %v2103_v4 = vld [vmem:[#allocation2 + $0xb8] sm:$0xff]  ;;  %v2104_v1 = vld [vmem:[#allocation2 + $0x60] sm:$0xff] }
 0x2b4   : > { %v2102_v10 = vld [vmem:[#allocation2 + $0xe8] sm:$0xff]  ;;  %2141 = vst [vmem:[%s3627_s9 + $0x8] sm:$0xff] %v2125_v0  ;;  %v2128_v3 = vpack.c.bf16 %v2101_v56, %v2100_v41  ;;  %v2105_v2 = vld [vmem:[#allocation2 + $0xf0] sm:$0xff]  ;;  %v2107_v11 = vld [vmem:[#allocation2 + $0x78] sm:$0xff] }
 0x2b5   : > { %v2129_v47 = vpack.c.bf16 %v2103_v4, %v2102_v10  ;;  %v2106_v28 = vld [vmem:[#allocation2 + $0x8] sm:$0xff]  ;;  %2142 = vst [vmem:[%s3627_s9 + $0x10] sm:$0xff] %v2126_v14  ;;  %v2130_v9 = vpack.c.bf16 %v2105_v2, %v2104_v1  ;;  %v2108_v33 = vld [vmem:[#allocation2 + $0x38] sm:$0xff]  ;;  %v2110_v63 = vld [vmem:[#allocation2 + $0x40] sm:$0xff] }
 0x2b6   : > { %v2109_v39 = vld [vmem:[#allocation2 + $0x58] sm:$0xff]  ;;  %2143 = vst [vmem:[%s3627_s9 + $0x18] sm:$0xff] %v2127_v55  ;;  %v2131_v34 = vpack.c.bf16 %v2107_v11, %v2106_v28  ;;  %v2111_v12 = vld [vmem:[#allocation2 + $0xc8] sm:$0xff]  ;;  %v2112_v20 = vld [vmem:[#allocation2 + $0xe0] sm:$0xff] }
 0x2b7   : > { %2144 = vst [vmem:[%s3627_s9 + $0x20] sm:$0xff] %v2128_v3  ;;  %v2132_v45 = vpack.c.bf16 %v2109_v39, %v2108_v33  ;;  %v2113_v46 = vld [vmem:[#allocation2 + $0x90] sm:$0xff]  ;;  %v2115_v25 = vld [vmem:[#allocation2 + $0xc0] sm:$0xff]  ;;  %v2133_v36 = vpack.c.bf16 %v2111_v12, %v2110_v63  ;;  %v2116_v5 = vld [vmem:[#allocation2 + $0xa8] sm:$0xff] }
 0x2b8   : > { %v2114_v17 = vld [vmem:[#allocation2 + $0x70] sm:$0xff]  ;;  %2145 = vst [vmem:[%s3627_s9 + $0x28] sm:$0xff] %v2129_v47  ;;  %v2134_v8 = vpack.c.bf16 %v2113_v46, %v2112_v20  ;;  %v2119_v53 = vld [vmem:[#allocation2 + $0x28] sm:$0xff]  ;;  %v2120_v32 = vld [vmem:[#allocation2 + $0xa0] sm:$0xff] }
 0x2b9   : > { %v2117_v58 = vld [vmem:[#allocation2 + $0xd0] sm:$0xff]  ;;  %2146 = vst [vmem:[%s3627_s9 + $0x30] sm:$0xff] %v2130_v9  ;;  %v2135_v27 = vpack.c.bf16 %v2115_v25, %v2114_v17  ;;  %v2121_v6 = vld [vmem:[#allocation2 + $0xf8] sm:$0xff]  ;;  %v2122_v52 = vld [vmem:[#allocation2 + $0x20] sm:$0xff] }
 0x2ba   : > { %v2118_v18 = vld [vmem:[#allocation2 + $0x10] sm:$0xff]  ;;  %2147 = vst [vmem:[%s3627_s9 + $0x38] sm:$0xff] %v2131_v34  ;;  %v2136_v42 = vpack.c.bf16 %v2117_v58, %v2116_v5  ;;  %v2123_v37 = vld [vmem:[#allocation2 + $0x98] sm:$0xff]  ;;  %v2138_v40 = vpack.c.bf16 %v2121_v6, %v2120_v32 }
 0x2bb   : > { %2148 = vst [vmem:[%s3627_s9 + $0x40] sm:$0xff] %v2132_v45  ;;  %v2137_v60 = vpack.c.bf16 %v2119_v53, %v2118_v18  ;;  %v2139_v49 = vpack.c.bf16 %v2123_v37, %v2122_v52 }
 0x2bc   : > { %2149 = vst [vmem:[%s3627_s9 + $0x48] sm:$0xff] %v2133_v36 }
 0x2bd   : > { %2150 = vst [vmem:[%s3627_s9 + $0x50] sm:$0xff] %v2134_v8 }
 0x2be   : > { %2151 = vst [vmem:[%s3627_s9 + $0x58] sm:$0xff] %v2135_v27 }
 0x2bf   : > { %2152 = vst [vmem:[%s3627_s9 + $0x60] sm:$0xff] %v2136_v42 }
 0x2c0   : > { %2153 = vst [vmem:[%s3627_s9 + $0x68] sm:$0xff] %v2137_v60 }
 0x2c1   : > { %2154 = vst [vmem:[%s3627_s9 + $0x70] sm:$0xff] %v2138_v40 }
 0x2c2   : > { %2155 = vst [vmem:[%s3627_s9 + $0x78] sm:$0xff] %v2139_v49 }
 0x2c3 PF: > { %s4320_s21 = sld [smem:[#allocation18_spill]]  ;;  %s2170_s13 = sshll.u32 %s3627_s9, 4  ;;  %s2171_s13 = int_to_ptr.vmem [resolvable:$true] %s2170_s13 }
 0x2c4   : > { %s4322_s6 = sld [smem:[#allocation33_spill]]  ;;  %s2157_s30 = scalar_lea.sflag [#allocation5], %s3601_s20 }
 0x2c9   : > { %s2922_s26 = sshll.u32 %s4320_s21, 7 }
 0x2ca   : > { %s2169_s10 = scalar_lea.hbm %s4322_s6, %s2922_s26  ;;  %s3250_s12 = scalar_lea.hbm %s4322_s6, 256 }
 0x2cb   : > { %s2172_s14 = sshll.u32 %s2169_s10, 4  ;;  %s2173_s14 = int_to_ptr.hbm [resolvable:$true] %s2172_s14 }
 0x2cc   : > { %s3244_s1 = sshra.s32 %s2173_s14, 4  ;;  %s3245_s1 = int_to_ptr.hbm [resolvable:$true] %s3244_s1 }
 0x2cd   : > { %s3246_s2 = scalar_lea.hbm %s3245_s1, 128  ;;  %p3251_p4 = scmp.lt.s32.totalorder %s3245_s1, %s4322_s6 }
 0x2ce   : > { %p3247_p10 = scmp.ne.s32.totalorder %s3245_s1, %s3246_s2  ;;  %p3252_p6 = scmp.lt.s32.totalorder %s3250_s12, %s3246_s2 }
 0x2d0   : > { %p3248_p13 = pnand %p3247_p10, %p3552_p12  ;;  %p3253_p1 = por %p3252_p6, %p3251_p4 }
 0x2d2   : > { %p3249_p2 = pneg %p3248_p13 }
 0x2d4   : > { %p3254_p0 = pnand %p3253_p1, %p3249_p2 }
 0x2d6   : > { %3257 = shalt.err (!%p3254_p0)
}
 0x2d7   : > { %s3366_s20 = smov 128   ;;  %s3367_s24 = smov 8  }
 0x2d8   : > { %2931 = dma.vmem_to_hbm [thread:$0]  (%p3552_p12), %s2171_s13, 2048, %s2173_s14, %s2157_s30, %s3366_s20, %s3366_s20, %s3367_s24  }
 0x2d9 PF: > { %s4323_s28 = sld [smem:[#allocation16_spill]]  ;;  %p2951_p8 = scmp.ge.s32.totalorder %s3360_s25, 2 }
 0x2db   : > { %p2947_p9 = pnand %p2951_p8, %p3563_p3 }
 0x2dd   : > { %p2948_p11 = pneg %p2947_p9 }
 0x2df   : > { %s2187_s5 = sand.u32 1, %s4323_s28  }
 0x2e0   : > { %s2188_s15 = scalar_lea.sflag [#allocation5], %s2187_s5 }
 0x2e1   : > { %3315 = dma.done.wait (%p2948_p11), %s2188_s15, 2048  }
 0x2e2   : > { %3317 = vsyncadd (%p2948_p11), %s2188_s15, 4294965248  ;;  %s26_s25 = sadd.s32 1, %s3360_s25   ;;  %s4325_s27 = sld [smem:[#allocation21_spill]] }
 0x2e3   : > { %p23_p5 = scmp.ge.s32.totalorder %s26_s25, 6   ;;  %s4326_s9 = sld [smem:[#allocation17_spill]] }
 0x2e4   : > { %s4327_s20 = sld [smem:[#allocation24_spill]]  ;;  %s4331_s15 = smov %s3324_s16 }
 0x2e5   : > { %s4328_s22 = sld [smem:[#allocation19_spill]]  ;;  %s4332_s16 = smov %s3328_s17 }
 0x2e6   : > { %s4329_s11 = sld [smem:[#allocation20_spill]]  ;;  %s4334_s18 = smov %s3336_s19 }
 0x2e7   : > { %s4330_s24 = sld [smem:[#allocation22_spill]]  ;;  %s4336_s21 = smov %s3352_s23 }
 0x2e8   : > { %s4333_s17 = smov %s4325_s27  ;;  %25 = sbr.rel (!%p23_p5) target bundleno = 18 (0x12), region = 126 }
 0x2e9   : > { %s4335_s19 = smov %s4326_s9 }
 0x2ec   : > { %s4337_s23 = smov %s4329_s11 }
 0x2ed   :  { %2194 = vsyncpa [#allocation4], 1 }
 0x2ee   :  { %2196 = vsyncpa [#allocation4 + $0x1], 1 }
 0x2ef   :  { %2197 = vsyncpa [#allocation7], 1 }
 0x2f0   :  { %2199 = vsyncpa [#allocation7 + $0x1], 1 }
 0x2f1   :  { %2200 = vsyncpa [#allocation10], 1 }
 0x2f2   :  { %2202 = vsyncpa [#allocation10 + $0x1], 1 }
 0x2f3   :  { %2203 = vsyncpa [#allocation5], 1 }
 0x2f4   :  { %2205 = vsyncpa [#allocation5 + $0x1], 1 }

</bundles_post_ra>
